<compile_context>
chip_gen: v6e
topology: v6e:2x2x1
jax: 0.10.0
libtpu: 0.0.40
codegen_flags: <defaults>
</compile_context>

<pallas_src>
import functools

import jax
import jax.numpy as jnp
from jax.experimental import pallas as pl
from jax.experimental.pallas import tpu as pltpu


# ---------------------------------------------------------------------------
# Fused Pallas kernel: conv1 -> conv2 -> GAP -> FC -> FNRD count, per sample.
# ---------------------------------------------------------------------------
def _fnrd_fused_kernel(x_ref, m9_ref, w1_ref, b1_ref, w2_ref, b2_ref,
                       wfc_ref, bfc_ref, min1_ref, max1_ref, min2_ref,
                       max2_ref, logits_ref, conf_ref, *, width, n_act):
    hw = x_ref.shape[2]
    pad = width + 1                      # covers lane shifts in [-(W+1), W+1]
    x = x_ref[0]                         # (C_in_pad, HW)  channel-major
    m9 = m9_ref[...]                     # (9, HW) per-offset validity masks

    def conv3x3(inp, w2d, bcol):
        """Weight-stationary 3x3 conv: out (C_out, HW) = sum_k Wk @ shift_k(inp)."""
        cin = inp.shape[0]
        c_out = bcol.shape[0]
        zpad = jnp.zeros((cin, pad), jnp.float32)
        xp = jnp.concatenate([zpad, inp, zpad], axis=1)      # (cin, HW + 2*pad)
        acc = jnp.zeros((c_out, hw), jnp.float32)
        for k in range(9):                                   # fused im2col
            di, dj = k // 3, k % 3
            off = pad + (di - 1) * width + (dj - 1)
            xk = xp[:, off:off + hw] * m9[k:k + 1, :]        # masked lane shift
            wk = w2d[k * c_out:(k + 1) * c_out, :]           # (c_out, cin)
            acc = acc + jnp.dot(wk, xk, preferred_element_type=jnp.float32)
        return jnp.maximum(acc + bcol, 0.0)                  # bias + ReLU

    a1 = conv3x3(x, w1_ref[...], b1_ref[...])                # (C1, HW)
    a2 = conv3x3(a1, w2_ref[...], b2_ref[...])               # (C2, HW)

    # --- classifier head: global average pool + FC (channel-major) --------
    pooled = jnp.sum(a2, axis=1, keepdims=True) * (1.0 / hw)           # (C2, 1)
    logits_ref[0] = (jnp.dot(wfc_ref[...], pooled,
                             preferred_element_type=jnp.float32)
                     + bfc_ref[...])                                   # (NCLS, 1)

    # --- fused FNRD outlier count (f32 accumulation, exact for N < 2^24) --
    out1 = ((a1 > max1_ref[...]).astype(jnp.float32) +
            (a1 < min1_ref[...]).astype(jnp.float32))
    out2 = ((a2 > max2_ref[...]).astype(jnp.float32) +
            (a2 < min2_ref[...]).astype(jnp.float32))
    cnt1 = jnp.sum(jnp.sum(out1, axis=1, keepdims=True), axis=0, keepdims=True)
    cnt2 = jnp.sum(jnp.sum(out2, axis=1, keepdims=True), axis=0, keepdims=True)
    conf_ref[0] = 1.0 - (cnt1 + cnt2) * (1.0 / n_act)                  # (1, 1)


# ---------------------------------------------------------------------------
# One-time layout preparation (weights, MFR bounds, shift masks).
# ---------------------------------------------------------------------------
def _conv_valid_masks(H, W):
    """(9, H*W) f32 masks: 1 where the shifted 3x3 tap lies inside the image."""
    p = jnp.arange(H * W, dtype=jnp.int32)
    hh, ww = p // W, p % W
    rows = []
    for di in range(3):
        for dj in range(3):
            ok = ((hh + di - 1 >= 0) & (hh + di - 1 < H) &
                  (ww + dj - 1 >= 0) & (ww + dj - 1 < W))
            rows.append(ok.astype(jnp.float32))
    return jnp.stack(rows, axis=0)


def prepare_fnrd(params, min_mask, max_mask, H, W):
    """One-time re-layout of weights and MFR bounds (channel-major, padded)."""
    C1, C_in = params["w1"].shape[0], params["w1"].shape[1]
    C2 = params["w2"].shape[0]
    NCLS = params["wfc"].shape[1]
    HW = H * W
    CP = ((C_in + 7) // 8) * 8           # pad contraction dim to 8 sublanes
    w1 = jnp.transpose(params["w1"], (2, 3, 0, 1)).reshape(9 * C1, C_in)
    return {
        "w1": jnp.pad(w1, ((0, 0), (0, CP - C_in))),                # (9*C1, CP)
        "b1": params["b1"].reshape(C1, 1),
        "w2": jnp.transpose(params["w2"], (2, 3, 0, 1)).reshape(9 * C2, C1),
        "b2": params["b2"].reshape(C2, 1),
        "wfc": params["wfc"].T,                                     # (NCLS, C2)
        "bfc": params["bfc"].reshape(NCLS, 1),
        # Per-sample channel-major order == torch NCHW .view(B, -1) order, so
        # the MFR bounds only need a reshape (done once here, not per call).
        "min1": min_mask[:C1 * HW].reshape(C1, HW),
        "max1": max_mask[:C1 * HW].reshape(C1, HW),
        "min2": min_mask[C1 * HW:].reshape(C2, HW),
        "max2": max_mask[C1 * HW:].reshape(C2, HW),
        "m9": _conv_valid_masks(H, W),                              # (9, HW)
    }


# ---------------------------------------------------------------------------
# Forward pass (logits, conf) like FNRDModel.forward, in one pallas_call.
# ---------------------------------------------------------------------------
def fnrd_forward(x, prep):
    B, C_in, H, W = x.shape
    HW = H * W
    CP = prep["w1"].shape[1]
    C1 = prep["b1"].shape[0]
    C2 = prep["b2"].shape[0]
    NCLS = prep["bfc"].shape[0]
    n_act = (C1 + C2) * HW

    # Channel-major input, zero-padded to CP channels (aligned contraction).
    x_cm = jnp.pad(x, ((0, 0), (0, CP - C_in), (0, 0), (0, 0))).reshape(B, CP, HW)

    kernel = functools.partial(_fnrd_fused_kernel, width=W, n_act=n_act)
    logits3, conf3 = pl.pallas_call(
        kernel,
        grid=(B,),
        in_specs=[
            pl.BlockSpec((1, CP, HW), lambda b: (b, 0, 0)),    # x (per sample)
            pl.BlockSpec((9, HW), lambda b: (0, 0)),           # shift masks
            pl.BlockSpec((9 * C1, CP), lambda b: (0, 0)),      # conv1 weights
            pl.BlockSpec((C1, 1), lambda b: (0, 0)),           # conv1 bias
            pl.BlockSpec((9 * C2, C1), lambda b: (0, 0)),      # conv2 weights
            pl.BlockSpec((C2, 1), lambda b: (0, 0)),           # conv2 bias
            pl.BlockSpec((NCLS, C2), lambda b: (0, 0)),        # fc weight^T
            pl.BlockSpec((NCLS, 1), lambda b: (0, 0)),         # fc bias
            pl.BlockSpec((C1, HW), lambda b: (0, 0)),          # min bounds L1
            pl.BlockSpec((C1, HW), lambda b: (0, 0)),          # max bounds L1
            pl.BlockSpec((C2, HW), lambda b: (0, 0)),          # min bounds L2
            pl.BlockSpec((C2, HW), lambda b: (0, 0)),          # max bounds L2
        ],
        out_shape=(jax.ShapeDtypeStruct((B, NCLS, 1), jnp.float32),
                   jax.ShapeDtypeStruct((B, 1, 1), jnp.float32)),
        out_specs=(pl.BlockSpec((1, NCLS, 1), lambda b: (b, 0, 0)),
                   pl.BlockSpec((1, 1, 1), lambda b: (b, 0, 0))),
        compiler_params=pltpu.CompilerParams(
            dimension_semantics=("parallel",)),   # one sample per TC on v7x
    )(x_cm, prep["m9"], prep["w1"], prep["b1"], prep["w2"], prep["b2"],
      prep["wfc"], prep["bfc"], prep["min1"], prep["max1"],
      prep["min2"], prep["max2"])
    return logits3[:, :, 0], conf3[:, 0, 0]


# ---------------------------------------------------------------------------
# Main
# ---------------------------------------------------------------------------
if __name__ == "__main__":
    key = jax.random.PRNGKey(0)
    (k_x, k_w1, k_b1, k_w2, k_b2,
     k_wfc, k_bfc, k_min, k_max) = jax.random.split(key, 9)

    B, C_in, H, W = 2, 3, 16, 16
    C1, C2, NCLS = 8, 16, 10

    x = jax.random.normal(k_x, (B, C_in, H, W), jnp.float32)
    params = {
        "w1": 0.2 * jax.random.normal(k_w1, (C1, C_in, 3, 3), jnp.float32),
        "b1": 0.05 * jax.random.normal(k_b1, (C1,), jnp.float32),
        "w2": 0.2 * jax.random.normal(k_w2, (C2, C1, 3, 3), jnp.float32),
        "b2": 0.05 * jax.random.normal(k_b2, (C2,), jnp.float32),
        "wfc": 0.2 * jax.random.normal(k_wfc, (C2, NCLS), jnp.float32),
        "bfc": 0.05 * jax.random.normal(k_bfc, (NCLS,), jnp.float32),
    }

    # Deterministic synthetic MFR bounds over all probed activations
    # (torch NCHW flatten order, like FNRDModel's min/max masks).
    N_act = (C1 + C2) * H * W
    min_mask = jax.random.uniform(k_min, (N_act,), jnp.float32, 0.0, 0.05)
    max_mask = jax.random.uniform(k_max, (N_act,), jnp.float32, 0.2, 1.0)

    prep = prepare_fnrd(params, min_mask, max_mask, H, W)   # once, at init
    fwd = jax.jit(fnrd_forward)
    logits, conf = fwd(x, prep)
    jax.block_until_ready((logits, conf))

    # Pure-JAX reference of the FNRDModel forward semantics.
    def ref_forward(x):
        def conv_ref(xx, w, b):
            out = jax.lax.conv_general_dilated(
                xx, w, (1, 1), ((1, 1), (1, 1)),
                dimension_numbers=("NCHW", "OIHW", "NCHW"))
            return jnp.maximum(out + b[None, :, None, None], 0.0)
        a1 = conv_ref(x, params["w1"], params["b1"])
        a2 = conv_ref(a1, params["w2"], params["b2"])
        pooled = jnp.mean(a2, axis=(2, 3))
        lg = pooled @ params["wfc"] + params["bfc"]
        act = jnp.concatenate([a1.reshape(B, -1), a2.reshape(B, -1)], axis=1)
        n_out = (jnp.sum(act > max_mask[None, :], axis=1) +
                 jnp.sum(act < min_mask[None, :], axis=1))
        return lg, 1.0 - n_out / N_act

    ref_logits, ref_conf = ref_forward(x)
    assert jnp.allclose(logits, ref_logits, atol=1e-4, rtol=1e-4)
    # conf is a discrete count / N; allow a couple of threshold flips from f32
    # summation-order differences (each flip changes conf by 1/N ~ 1.6e-4).
    assert jnp.allclose(conf, ref_conf, atol=1e-3)

    print("KERNEL_OK")
</pallas_src>

<mosaic_0001>
module attributes {stable_mosaic.version = 11 : i64} {
  func.func @_fnrd_fused_kernel(%arg0: i32, %arg1: memref<1x8x256xf32, #tpu.memory_space<vmem>>, %arg2: memref<9x256xf32, #tpu.memory_space<vmem>>, %arg3: memref<72x8xf32, #tpu.memory_space<vmem>>, %arg4: memref<8x1xf32, #tpu.memory_space<vmem>>, %arg5: memref<144x8xf32, #tpu.memory_space<vmem>>, %arg6: memref<16x1xf32, #tpu.memory_space<vmem>>, %arg7: memref<10x16xf32, #tpu.memory_space<vmem>>, %arg8: memref<10x1xf32, #tpu.memory_space<vmem>>, %arg9: memref<8x256xf32, #tpu.memory_space<vmem>>, %arg10: memref<8x256xf32, #tpu.memory_space<vmem>>, %arg11: memref<16x256xf32, #tpu.memory_space<vmem>>, %arg12: memref<16x256xf32, #tpu.memory_space<vmem>>, %arg13: memref<1x10x1xf32, #tpu.memory_space<vmem>>, %arg14: memref<1x1x1xf32, #tpu.memory_space<vmem>>) attributes {dimension_semantics = [#tpu.dimension_semantics<parallel>], iteration_bounds = array<i64: 2>, scalar_prefetch = 0 : i64, scratch_operands = 0 : i64, tpu.core_type = #tpu.core_type<tc>, window_params = [{transform_indices = @transform_0, window_bounds = array<i64: 1, 8, 256>}, {pipeline_mode = #tpu.pipeline_mode<synchronous>, transform_indices = @transform_1, window_bounds = array<i64: 9, 256>}, {pipeline_mode = #tpu.pipeline_mode<synchronous>, transform_indices = @transform_2, window_bounds = array<i64: 72, 8>}, {pipeline_mode = #tpu.pipeline_mode<synchronous>, transform_indices = @transform_3, window_bounds = array<i64: 8, 1>}, {pipeline_mode = #tpu.pipeline_mode<synchronous>, transform_indices = @transform_4, window_bounds = array<i64: 144, 8>}, {pipeline_mode = #tpu.pipeline_mode<synchronous>, transform_indices = @transform_5, window_bounds = array<i64: 16, 1>}, {pipeline_mode = #tpu.pipeline_mode<synchronous>, transform_indices = @transform_6, window_bounds = array<i64: 10, 16>}, {pipeline_mode = #tpu.pipeline_mode<synchronous>, transform_indices = @transform_7, window_bounds = array<i64: 10, 1>}, {pipeline_mode = #tpu.pipeline_mode<synchronous>, transform_indices = @transform_8, window_bounds = array<i64: 8, 256>}, {pipeline_mode = #tpu.pipeline_mode<synchronous>, transform_indices = @transform_9, window_bounds = array<i64: 8, 256>}, {pipeline_mode = #tpu.pipeline_mode<synchronous>, transform_indices = @transform_10, window_bounds = array<i64: 16, 256>}, {pipeline_mode = #tpu.pipeline_mode<synchronous>, transform_indices = @transform_11, window_bounds = array<i64: 16, 256>}, {transform_indices = @transform_12, window_bounds = array<i64: 1, 10, 1>}, {transform_indices = @transform_13, window_bounds = array<i64: 1, 1, 1>}]} {
    %c0 = arith.constant 0 : index
    %c0_0 = arith.constant 0 : index
    %c0_1 = arith.constant 0 : index
    %0 = vector.load %arg1[%c0, %c0_0, %c0_1] : memref<1x8x256xf32, #tpu.memory_space<vmem>>, vector<1x8x256xf32>
    %1 = vector.shape_cast %0 : vector<1x8x256xf32> to vector<8x256xf32>
    %c0_2 = arith.constant 0 : index
    %c0_3 = arith.constant 0 : index
    %2 = vector.load %arg2[%c0_2, %c0_3] : memref<9x256xf32, #tpu.memory_space<vmem>>, vector<9x256xf32>
    %c0_4 = arith.constant 0 : index
    %c0_5 = arith.constant 0 : index
    %3 = vector.load %arg3[%c0_4, %c0_5] : memref<72x8xf32, #tpu.memory_space<vmem>>, vector<72x8xf32>
    %c0_6 = arith.constant 0 : index
    %c0_7 = arith.constant 0 : index
    %4 = vector.load %arg4[%c0_6, %c0_7] : memref<8x1xf32, #tpu.memory_space<vmem>>, vector<8x1xf32>
    %cst = arith.constant 0.000000e+00 : f32
    %5 = vector.broadcast %cst : f32 to vector<8x17xf32>
    %6 = tpu.concatenate %5, %1, %5 in 1 : vector<8x17xf32>, vector<8x256xf32>, vector<8x17xf32> -> vector<8x290xf32>
    %cst_8 = arith.constant 0.000000e+00 : f32
    %7 = vector.broadcast %cst_8 : f32 to vector<8x256xf32>
    %8 = vector.extract_strided_slice %6 {offsets = [0, 0], sizes = [8, 256], strides = [1, 1]} : vector<8x290xf32> to vector<8x256xf32>
    %9 = vector.extract_strided_slice %2 {offsets = [0, 0], sizes = [1, 256], strides = [1, 1]} : vector<9x256xf32> to vector<1x256xf32>
    %10 = vector.broadcast %9 : vector<1x256xf32> to vector<8x256xf32>
    %11 = arith.mulf %8, %10 : vector<8x256xf32>
    %12 = vector.extract_strided_slice %3 {offsets = [0, 0], sizes = [8, 8], strides = [1, 1]} : vector<72x8xf32> to vector<8x8xf32>
    %cst_9 = arith.constant dense<0.000000e+00> : vector<8x256xf32>
    %13 = tpu.matmul %12, %11, %cst_9 {dimension_numbers = #tpu.dot_dimension_numbers<[1], [0], [0], [1], [0, 0, 1, 1], [], []>} : vector<8x8xf32>, vector<8x256xf32>, vector<8x256xf32> -> vector<8x256xf32>
    %14 = arith.addf %7, %13 : vector<8x256xf32>
    %15 = vector.extract_strided_slice %6 {offsets = [0, 1], sizes = [8, 256], strides = [1, 1]} : vector<8x290xf32> to vector<8x256xf32>
    %16 = vector.extract_strided_slice %2 {offsets = [1, 0], sizes = [1, 256], strides = [1, 1]} : vector<9x256xf32> to vector<1x256xf32>
    %17 = vector.broadcast %16 : vector<1x256xf32> to vector<8x256xf32>
    %18 = arith.mulf %15, %17 : vector<8x256xf32>
    %19 = vector.extract_strided_slice %3 {offsets = [8, 0], sizes = [8, 8], strides = [1, 1]} : vector<72x8xf32> to vector<8x8xf32>
    %cst_10 = arith.constant dense<0.000000e+00> : vector<8x256xf32>
    %20 = tpu.matmul %19, %18, %cst_10 {dimension_numbers = #tpu.dot_dimension_numbers<[1], [0], [0], [1], [0, 0, 1, 1], [], []>} : vector<8x8xf32>, vector<8x256xf32>, vector<8x256xf32> -> vector<8x256xf32>
    %21 = arith.addf %14, %20 : vector<8x256xf32>
    %22 = vector.extract_strided_slice %6 {offsets = [0, 2], sizes = [8, 256], strides = [1, 1]} : vector<8x290xf32> to vector<8x256xf32>
    %23 = vector.extract_strided_slice %2 {offsets = [2, 0], sizes = [1, 256], strides = [1, 1]} : vector<9x256xf32> to vector<1x256xf32>
    %24 = vector.broadcast %23 : vector<1x256xf32> to vector<8x256xf32>
    %25 = arith.mulf %22, %24 : vector<8x256xf32>
    %26 = vector.extract_strided_slice %3 {offsets = [16, 0], sizes = [8, 8], strides = [1, 1]} : vector<72x8xf32> to vector<8x8xf32>
    %cst_11 = arith.constant dense<0.000000e+00> : vector<8x256xf32>
    %27 = tpu.matmul %26, %25, %cst_11 {dimension_numbers = #tpu.dot_dimension_numbers<[1], [0], [0], [1], [0, 0, 1, 1], [], []>} : vector<8x8xf32>, vector<8x256xf32>, vector<8x256xf32> -> vector<8x256xf32>
    %28 = arith.addf %21, %27 : vector<8x256xf32>
    %29 = vector.extract_strided_slice %6 {offsets = [0, 16], sizes = [8, 256], strides = [1, 1]} : vector<8x290xf32> to vector<8x256xf32>
    %30 = vector.extract_strided_slice %2 {offsets = [3, 0], sizes = [1, 256], strides = [1, 1]} : vector<9x256xf32> to vector<1x256xf32>
    %31 = vector.broadcast %30 : vector<1x256xf32> to vector<8x256xf32>
    %32 = arith.mulf %29, %31 : vector<8x256xf32>
    %33 = vector.extract_strided_slice %3 {offsets = [24, 0], sizes = [8, 8], strides = [1, 1]} : vector<72x8xf32> to vector<8x8xf32>
    %cst_12 = arith.constant dense<0.000000e+00> : vector<8x256xf32>
    %34 = tpu.matmul %33, %32, %cst_12 {dimension_numbers = #tpu.dot_dimension_numbers<[1], [0], [0], [1], [0, 0, 1, 1], [], []>} : vector<8x8xf32>, vector<8x256xf32>, vector<8x256xf32> -> vector<8x256xf32>
    %35 = arith.addf %28, %34 : vector<8x256xf32>
    %36 = vector.extract_strided_slice %6 {offsets = [0, 17], sizes = [8, 256], strides = [1, 1]} : vector<8x290xf32> to vector<8x256xf32>
    %37 = vector.extract_strided_slice %2 {offsets = [4, 0], sizes = [1, 256], strides = [1, 1]} : vector<9x256xf32> to vector<1x256xf32>
    %38 = vector.broadcast %37 : vector<1x256xf32> to vector<8x256xf32>
    %39 = arith.mulf %36, %38 : vector<8x256xf32>
    %40 = vector.extract_strided_slice %3 {offsets = [32, 0], sizes = [8, 8], strides = [1, 1]} : vector<72x8xf32> to vector<8x8xf32>
    %cst_13 = arith.constant dense<0.000000e+00> : vector<8x256xf32>
    %41 = tpu.matmul %40, %39, %cst_13 {dimension_numbers = #tpu.dot_dimension_numbers<[1], [0], [0], [1], [0, 0, 1, 1], [], []>} : vector<8x8xf32>, vector<8x256xf32>, vector<8x256xf32> -> vector<8x256xf32>
    %42 = arith.addf %35, %41 : vector<8x256xf32>
    %43 = vector.extract_strided_slice %6 {offsets = [0, 18], sizes = [8, 256], strides = [1, 1]} : vector<8x290xf32> to vector<8x256xf32>
    %44 = vector.extract_strided_slice %2 {offsets = [5, 0], sizes = [1, 256], strides = [1, 1]} : vector<9x256xf32> to vector<1x256xf32>
    %45 = vector.broadcast %44 : vector<1x256xf32> to vector<8x256xf32>
    %46 = arith.mulf %43, %45 : vector<8x256xf32>
    %47 = vector.extract_strided_slice %3 {offsets = [40, 0], sizes = [8, 8], strides = [1, 1]} : vector<72x8xf32> to vector<8x8xf32>
    %cst_14 = arith.constant dense<0.000000e+00> : vector<8x256xf32>
    %48 = tpu.matmul %47, %46, %cst_14 {dimension_numbers = #tpu.dot_dimension_numbers<[1], [0], [0], [1], [0, 0, 1, 1], [], []>} : vector<8x8xf32>, vector<8x256xf32>, vector<8x256xf32> -> vector<8x256xf32>
    %49 = arith.addf %42, %48 : vector<8x256xf32>
    %50 = vector.extract_strided_slice %6 {offsets = [0, 32], sizes = [8, 256], strides = [1, 1]} : vector<8x290xf32> to vector<8x256xf32>
    %51 = vector.extract_strided_slice %2 {offsets = [6, 0], sizes = [1, 256], strides = [1, 1]} : vector<9x256xf32> to vector<1x256xf32>
    %52 = vector.broadcast %51 : vector<1x256xf32> to vector<8x256xf32>
    %53 = arith.mulf %50, %52 : vector<8x256xf32>
    %54 = vector.extract_strided_slice %3 {offsets = [48, 0], sizes = [8, 8], strides = [1, 1]} : vector<72x8xf32> to vector<8x8xf32>
    %cst_15 = arith.constant dense<0.000000e+00> : vector<8x256xf32>
    %55 = tpu.matmul %54, %53, %cst_15 {dimension_numbers = #tpu.dot_dimension_numbers<[1], [0], [0], [1], [0, 0, 1, 1], [], []>} : vector<8x8xf32>, vector<8x256xf32>, vector<8x256xf32> -> vector<8x256xf32>
    %56 = arith.addf %49, %55 : vector<8x256xf32>
    %57 = vector.extract_strided_slice %6 {offsets = [0, 33], sizes = [8, 256], strides = [1, 1]} : vector<8x290xf32> to vector<8x256xf32>
    %58 = vector.extract_strided_slice %2 {offsets = [7, 0], sizes = [1, 256], strides = [1, 1]} : vector<9x256xf32> to vector<1x256xf32>
    %59 = vector.broadcast %58 : vector<1x256xf32> to vector<8x256xf32>
    %60 = arith.mulf %57, %59 : vector<8x256xf32>
    %61 = vector.extract_strided_slice %3 {offsets = [56, 0], sizes = [8, 8], strides = [1, 1]} : vector<72x8xf32> to vector<8x8xf32>
    %cst_16 = arith.constant dense<0.000000e+00> : vector<8x256xf32>
    %62 = tpu.matmul %61, %60, %cst_16 {dimension_numbers = #tpu.dot_dimension_numbers<[1], [0], [0], [1], [0, 0, 1, 1], [], []>} : vector<8x8xf32>, vector<8x256xf32>, vector<8x256xf32> -> vector<8x256xf32>
    %63 = arith.addf %56, %62 : vector<8x256xf32>
    %64 = vector.extract_strided_slice %6 {offsets = [0, 34], sizes = [8, 256], strides = [1, 1]} : vector<8x290xf32> to vector<8x256xf32>
    %65 = vector.extract_strided_slice %2 {offsets = [8, 0], sizes = [1, 256], strides = [1, 1]} : vector<9x256xf32> to vector<1x256xf32>
    %66 = vector.broadcast %65 : vector<1x256xf32> to vector<8x256xf32>
    %67 = arith.mulf %64, %66 : vector<8x256xf32>
    %68 = vector.extract_strided_slice %3 {offsets = [64, 0], sizes = [8, 8], strides = [1, 1]} : vector<72x8xf32> to vector<8x8xf32>
    %cst_17 = arith.constant dense<0.000000e+00> : vector<8x256xf32>
    %69 = tpu.matmul %68, %67, %cst_17 {dimension_numbers = #tpu.dot_dimension_numbers<[1], [0], [0], [1], [0, 0, 1, 1], [], []>} : vector<8x8xf32>, vector<8x256xf32>, vector<8x256xf32> -> vector<8x256xf32>
    %70 = arith.addf %63, %69 : vector<8x256xf32>
    %71 = vector.broadcast %4 : vector<8x1xf32> to vector<8x256xf32>
    %72 = arith.addf %70, %71 : vector<8x256xf32>
    %cst_18 = arith.constant 0.000000e+00 : f32
    %73 = vector.broadcast %cst_18 : f32 to vector<8x256xf32>
    %74 = arith.maximumf %72, %73 : vector<8x256xf32>
    %c0_19 = arith.constant 0 : index
    %c0_20 = arith.constant 0 : index
    %75 = vector.load %arg5[%c0_19, %c0_20] : memref<144x8xf32, #tpu.memory_space<vmem>>, vector<144x8xf32>
    %c0_21 = arith.constant 0 : index
    %c0_22 = arith.constant 0 : index
    %76 = vector.load %arg6[%c0_21, %c0_22] : memref<16x1xf32, #tpu.memory_space<vmem>>, vector<16x1xf32>
    %cst_23 = arith.constant 0.000000e+00 : f32
    %77 = vector.broadcast %cst_23 : f32 to vector<8x17xf32>
    %78 = tpu.concatenate %77, %74, %77 in 1 : vector<8x17xf32>, vector<8x256xf32>, vector<8x17xf32> -> vector<8x290xf32>
    %cst_24 = arith.constant 0.000000e+00 : f32
    %79 = vector.broadcast %cst_24 : f32 to vector<16x256xf32>
    %80 = vector.extract_strided_slice %78 {offsets = [0, 0], sizes = [8, 256], strides = [1, 1]} : vector<8x290xf32> to vector<8x256xf32>
    %81 = vector.extract_strided_slice %2 {offsets = [0, 0], sizes = [1, 256], strides = [1, 1]} : vector<9x256xf32> to vector<1x256xf32>
    %82 = vector.broadcast %81 : vector<1x256xf32> to vector<8x256xf32>
    %83 = arith.mulf %80, %82 : vector<8x256xf32>
    %84 = vector.extract_strided_slice %75 {offsets = [0, 0], sizes = [16, 8], strides = [1, 1]} : vector<144x8xf32> to vector<16x8xf32>
    %cst_25 = arith.constant dense<0.000000e+00> : vector<16x256xf32>
    %85 = tpu.matmul %84, %83, %cst_25 {dimension_numbers = #tpu.dot_dimension_numbers<[1], [0], [0], [1], [0, 0, 1, 1], [], []>} : vector<16x8xf32>, vector<8x256xf32>, vector<16x256xf32> -> vector<16x256xf32>
    %86 = arith.addf %79, %85 : vector<16x256xf32>
    %87 = vector.extract_strided_slice %78 {offsets = [0, 1], sizes = [8, 256], strides = [1, 1]} : vector<8x290xf32> to vector<8x256xf32>
    %88 = vector.extract_strided_slice %2 {offsets = [1, 0], sizes = [1, 256], strides = [1, 1]} : vector<9x256xf32> to vector<1x256xf32>
    %89 = vector.broadcast %88 : vector<1x256xf32> to vector<8x256xf32>
    %90 = arith.mulf %87, %89 : vector<8x256xf32>
    %91 = vector.extract_strided_slice %75 {offsets = [16, 0], sizes = [16, 8], strides = [1, 1]} : vector<144x8xf32> to vector<16x8xf32>
    %cst_26 = arith.constant dense<0.000000e+00> : vector<16x256xf32>
    %92 = tpu.matmul %91, %90, %cst_26 {dimension_numbers = #tpu.dot_dimension_numbers<[1], [0], [0], [1], [0, 0, 1, 1], [], []>} : vector<16x8xf32>, vector<8x256xf32>, vector<16x256xf32> -> vector<16x256xf32>
    %93 = arith.addf %86, %92 : vector<16x256xf32>
    %94 = vector.extract_strided_slice %78 {offsets = [0, 2], sizes = [8, 256], strides = [1, 1]} : vector<8x290xf32> to vector<8x256xf32>
    %95 = vector.extract_strided_slice %2 {offsets = [2, 0], sizes = [1, 256], strides = [1, 1]} : vector<9x256xf32> to vector<1x256xf32>
    %96 = vector.broadcast %95 : vector<1x256xf32> to vector<8x256xf32>
    %97 = arith.mulf %94, %96 : vector<8x256xf32>
    %98 = vector.extract_strided_slice %75 {offsets = [32, 0], sizes = [16, 8], strides = [1, 1]} : vector<144x8xf32> to vector<16x8xf32>
    %cst_27 = arith.constant dense<0.000000e+00> : vector<16x256xf32>
    %99 = tpu.matmul %98, %97, %cst_27 {dimension_numbers = #tpu.dot_dimension_numbers<[1], [0], [0], [1], [0, 0, 1, 1], [], []>} : vector<16x8xf32>, vector<8x256xf32>, vector<16x256xf32> -> vector<16x256xf32>
    %100 = arith.addf %93, %99 : vector<16x256xf32>
    %101 = vector.extract_strided_slice %78 {offsets = [0, 16], sizes = [8, 256], strides = [1, 1]} : vector<8x290xf32> to vector<8x256xf32>
    %102 = vector.extract_strided_slice %2 {offsets = [3, 0], sizes = [1, 256], strides = [1, 1]} : vector<9x256xf32> to vector<1x256xf32>
    %103 = vector.broadcast %102 : vector<1x256xf32> to vector<8x256xf32>
    %104 = arith.mulf %101, %103 : vector<8x256xf32>
    %105 = vector.extract_strided_slice %75 {offsets = [48, 0], sizes = [16, 8], strides = [1, 1]} : vector<144x8xf32> to vector<16x8xf32>
    %cst_28 = arith.constant dense<0.000000e+00> : vector<16x256xf32>
    %106 = tpu.matmul %105, %104, %cst_28 {dimension_numbers = #tpu.dot_dimension_numbers<[1], [0], [0], [1], [0, 0, 1, 1], [], []>} : vector<16x8xf32>, vector<8x256xf32>, vector<16x256xf32> -> vector<16x256xf32>
    %107 = arith.addf %100, %106 : vector<16x256xf32>
    %108 = vector.extract_strided_slice %78 {offsets = [0, 17], sizes = [8, 256], strides = [1, 1]} : vector<8x290xf32> to vector<8x256xf32>
    %109 = vector.extract_strided_slice %2 {offsets = [4, 0], sizes = [1, 256], strides = [1, 1]} : vector<9x256xf32> to vector<1x256xf32>
    %110 = vector.broadcast %109 : vector<1x256xf32> to vector<8x256xf32>
    %111 = arith.mulf %108, %110 : vector<8x256xf32>
    %112 = vector.extract_strided_slice %75 {offsets = [64, 0], sizes = [16, 8], strides = [1, 1]} : vector<144x8xf32> to vector<16x8xf32>
    %cst_29 = arith.constant dense<0.000000e+00> : vector<16x256xf32>
    %113 = tpu.matmul %112, %111, %cst_29 {dimension_numbers = #tpu.dot_dimension_numbers<[1], [0], [0], [1], [0, 0, 1, 1], [], []>} : vector<16x8xf32>, vector<8x256xf32>, vector<16x256xf32> -> vector<16x256xf32>
    %114 = arith.addf %107, %113 : vector<16x256xf32>
    %115 = vector.extract_strided_slice %78 {offsets = [0, 18], sizes = [8, 256], strides = [1, 1]} : vector<8x290xf32> to vector<8x256xf32>
    %116 = vector.extract_strided_slice %2 {offsets = [5, 0], sizes = [1, 256], strides = [1, 1]} : vector<9x256xf32> to vector<1x256xf32>
    %117 = vector.broadcast %116 : vector<1x256xf32> to vector<8x256xf32>
    %118 = arith.mulf %115, %117 : vector<8x256xf32>
    %119 = vector.extract_strided_slice %75 {offsets = [80, 0], sizes = [16, 8], strides = [1, 1]} : vector<144x8xf32> to vector<16x8xf32>
    %cst_30 = arith.constant dense<0.000000e+00> : vector<16x256xf32>
    %120 = tpu.matmul %119, %118, %cst_30 {dimension_numbers = #tpu.dot_dimension_numbers<[1], [0], [0], [1], [0, 0, 1, 1], [], []>} : vector<16x8xf32>, vector<8x256xf32>, vector<16x256xf32> -> vector<16x256xf32>
    %121 = arith.addf %114, %120 : vector<16x256xf32>
    %122 = vector.extract_strided_slice %78 {offsets = [0, 32], sizes = [8, 256], strides = [1, 1]} : vector<8x290xf32> to vector<8x256xf32>
    %123 = vector.extract_strided_slice %2 {offsets = [6, 0], sizes = [1, 256], strides = [1, 1]} : vector<9x256xf32> to vector<1x256xf32>
    %124 = vector.broadcast %123 : vector<1x256xf32> to vector<8x256xf32>
    %125 = arith.mulf %122, %124 : vector<8x256xf32>
    %126 = vector.extract_strided_slice %75 {offsets = [96, 0], sizes = [16, 8], strides = [1, 1]} : vector<144x8xf32> to vector<16x8xf32>
    %cst_31 = arith.constant dense<0.000000e+00> : vector<16x256xf32>
    %127 = tpu.matmul %126, %125, %cst_31 {dimension_numbers = #tpu.dot_dimension_numbers<[1], [0], [0], [1], [0, 0, 1, 1], [], []>} : vector<16x8xf32>, vector<8x256xf32>, vector<16x256xf32> -> vector<16x256xf32>
    %128 = arith.addf %121, %127 : vector<16x256xf32>
    %129 = vector.extract_strided_slice %78 {offsets = [0, 33], sizes = [8, 256], strides = [1, 1]} : vector<8x290xf32> to vector<8x256xf32>
    %130 = vector.extract_strided_slice %2 {offsets = [7, 0], sizes = [1, 256], strides = [1, 1]} : vector<9x256xf32> to vector<1x256xf32>
    %131 = vector.broadcast %130 : vector<1x256xf32> to vector<8x256xf32>
    %132 = arith.mulf %129, %131 : vector<8x256xf32>
    %133 = vector.extract_strided_slice %75 {offsets = [112, 0], sizes = [16, 8], strides = [1, 1]} : vector<144x8xf32> to vector<16x8xf32>
    %cst_32 = arith.constant dense<0.000000e+00> : vector<16x256xf32>
    %134 = tpu.matmul %133, %132, %cst_32 {dimension_numbers = #tpu.dot_dimension_numbers<[1], [0], [0], [1], [0, 0, 1, 1], [], []>} : vector<16x8xf32>, vector<8x256xf32>, vector<16x256xf32> -> vector<16x256xf32>
    %135 = arith.addf %128, %134 : vector<16x256xf32>
    %136 = vector.extract_strided_slice %78 {offsets = [0, 34], sizes = [8, 256], strides = [1, 1]} : vector<8x290xf32> to vector<8x256xf32>
    %137 = vector.extract_strided_slice %2 {offsets = [8, 0], sizes = [1, 256], strides = [1, 1]} : vector<9x256xf32> to vector<1x256xf32>
    %138 = vector.broadcast %137 : vector<1x256xf32> to vector<8x256xf32>
    %139 = arith.mulf %136, %138 : vector<8x256xf32>
    %140 = vector.extract_strided_slice %75 {offsets = [128, 0], sizes = [16, 8], strides = [1, 1]} : vector<144x8xf32> to vector<16x8xf32>
    %cst_33 = arith.constant dense<0.000000e+00> : vector<16x256xf32>
    %141 = tpu.matmul %140, %139, %cst_33 {dimension_numbers = #tpu.dot_dimension_numbers<[1], [0], [0], [1], [0, 0, 1, 1], [], []>} : vector<16x8xf32>, vector<8x256xf32>, vector<16x256xf32> -> vector<16x256xf32>
    %142 = arith.addf %135, %141 : vector<16x256xf32>
    %143 = vector.broadcast %76 : vector<16x1xf32> to vector<16x256xf32>
    %144 = arith.addf %142, %143 : vector<16x256xf32>
    %cst_34 = arith.constant 0.000000e+00 : f32
    %145 = vector.broadcast %cst_34 : f32 to vector<16x256xf32>
    %146 = arith.maximumf %144, %145 : vector<16x256xf32>
    %cst_35 = arith.constant dense<0.000000e+00> : vector<16xf32>
    %147 = vector.multi_reduction <add>, %146, %cst_35 [1] : vector<16x256xf32> to vector<16xf32>
    %148 = vector.shape_cast %147 : vector<16xf32> to vector<16x1xf32>
    %cst_36 = arith.constant 3.906250e-03 : f32
    %149 = vector.broadcast %cst_36 : f32 to vector<16x1xf32>
    %150 = arith.mulf %148, %149 : vector<16x1xf32>
    %c0_37 = arith.constant 0 : index
    %c0_38 = arith.constant 0 : index
    %151 = vector.load %arg7[%c0_37, %c0_38] : memref<10x16xf32, #tpu.memory_space<vmem>>, vector<10x16xf32>
    %cst_39 = arith.constant dense<0.000000e+00> : vector<10x1xf32>
    %152 = tpu.matmul %151, %150, %cst_39 {dimension_numbers = #tpu.dot_dimension_numbers<[1], [0], [0], [1], [0, 0, 1, 1], [], []>} : vector<10x16xf32>, vector<16x1xf32>, vector<10x1xf32> -> vector<10x1xf32>
    %c0_40 = arith.constant 0 : index
    %c0_41 = arith.constant 0 : index
    %153 = vector.load %arg8[%c0_40, %c0_41] : memref<10x1xf32, #tpu.memory_space<vmem>>, vector<10x1xf32>
    %154 = arith.addf %152, %153 : vector<10x1xf32>
    %c0_42 = arith.constant 0 : index
    %c0_43 = arith.constant 0 : index
    %c0_44 = arith.constant 0 : index
    %155 = vector.load %arg13[%c0_42, %c0_43, %c0_44] : memref<1x10x1xf32, #tpu.memory_space<vmem>>, vector<1x10x1xf32>
    %156 = vector.shape_cast %155 : vector<1x10x1xf32> to vector<10x1xf32>
    %157 = vector.shape_cast %154 : vector<10x1xf32> to vector<1x10x1xf32>
    tpu.vector_store %arg13[%c0_42, %c0_43, %c0_44], %157 {strides = array<i32>} : memref<1x10x1xf32, #tpu.memory_space<vmem>>, vector<1x10x1xf32>,
    %c0_45 = arith.constant 0 : index
    %c0_46 = arith.constant 0 : index
    %158 = vector.load %arg10[%c0_45, %c0_46] : memref<8x256xf32, #tpu.memory_space<vmem>>, vector<8x256xf32>
    %159 = arith.cmpf ogt, %74, %158 : vector<8x256xf32>
    %160 = arith.extui %159 : vector<8x256xi1> to vector<8x256xi32>
    %161 = arith.sitofp %160 : vector<8x256xi32> to vector<8x256xf32>
    %c0_47 = arith.constant 0 : index
    %c0_48 = arith.constant 0 : index
    %162 = vector.load %arg9[%c0_47, %c0_48] : memref<8x256xf32, #tpu.memory_space<vmem>>, vector<8x256xf32>
    %163 = arith.cmpf olt, %74, %162 : vector<8x256xf32>
    %164 = arith.extui %163 : vector<8x256xi1> to vector<8x256xi32>
    %165 = arith.sitofp %164 : vector<8x256xi32> to vector<8x256xf32>
    %166 = arith.addf %161, %165 : vector<8x256xf32>
    %c0_49 = arith.constant 0 : index
    %c0_50 = arith.constant 0 : index
    %167 = vector.load %arg12[%c0_49, %c0_50] : memref<16x256xf32, #tpu.memory_space<vmem>>, vector<16x256xf32>
    %168 = arith.cmpf ogt, %146, %167 : vector<16x256xf32>
    %169 = arith.extui %168 : vector<16x256xi1> to vector<16x256xi32>
    %170 = arith.sitofp %169 : vector<16x256xi32> to vector<16x256xf32>
    %c0_51 = arith.constant 0 : index
    %c0_52 = arith.constant 0 : index
    %171 = vector.load %arg11[%c0_51, %c0_52] : memref<16x256xf32, #tpu.memory_space<vmem>>, vector<16x256xf32>
    %172 = arith.cmpf olt, %146, %171 : vector<16x256xf32>
    %173 = arith.extui %172 : vector<16x256xi1> to vector<16x256xi32>
    %174 = arith.sitofp %173 : vector<16x256xi32> to vector<16x256xf32>
    %175 = arith.addf %170, %174 : vector<16x256xf32>
    %cst_53 = arith.constant dense<0.000000e+00> : vector<8xf32>
    %176 = vector.multi_reduction <add>, %166, %cst_53 [1] : vector<8x256xf32> to vector<8xf32>
    %177 = vector.shape_cast %176 : vector<8xf32> to vector<8x1xf32>
    %cst_54 = arith.constant dense<0.000000e+00> : vector<1xf32>
    %178 = vector.multi_reduction <add>, %177, %cst_54 [0] : vector<8x1xf32> to vector<1xf32>
    %179 = vector.shape_cast %178 : vector<1xf32> to vector<1x1xf32>
    %cst_55 = arith.constant dense<0.000000e+00> : vector<16xf32>
    %180 = vector.multi_reduction <add>, %175, %cst_55 [1] : vector<16x256xf32> to vector<16xf32>
    %181 = vector.shape_cast %180 : vector<16xf32> to vector<16x1xf32>
    %cst_56 = arith.constant dense<0.000000e+00> : vector<1xf32>
    %182 = vector.multi_reduction <add>, %181, %cst_56 [0] : vector<16x1xf32> to vector<1xf32>
    %183 = vector.shape_cast %182 : vector<1xf32> to vector<1x1xf32>
    %184 = arith.addf %179, %183 : vector<1x1xf32>
    %cst_57 = arith.constant 1.62760422E-4 : f32
    %185 = vector.broadcast %cst_57 : f32 to vector<1x1xf32>
    %186 = arith.mulf %184, %185 : vector<1x1xf32>
    %cst_58 = arith.constant 1.000000e+00 : f32
    %187 = vector.broadcast %cst_58 : f32 to vector<1x1xf32>
    %188 = arith.subf %187, %186 : vector<1x1xf32>
    %c0_59 = arith.constant 0 : index
    %c0_60 = arith.constant 0 : index
    %c0_61 = arith.constant 0 : index
    %189 = vector.load %arg14[%c0_59, %c0_60, %c0_61] : memref<1x1x1xf32, #tpu.memory_space<vmem>>, vector<1x1x1xf32>
    %190 = vector.shape_cast %189 : vector<1x1x1xf32> to vector<1x1xf32>
    %191 = vector.shape_cast %188 : vector<1x1xf32> to vector<1x1x1xf32>
    tpu.vector_store %arg14[%c0_59, %c0_60, %c0_61], %191 {strides = array<i32>} : memref<1x1x1xf32, #tpu.memory_space<vmem>>, vector<1x1x1xf32>,
    return
  }
  func.func @transform_0(%arg0: i32) -> (i32, i32, i32) {
    %c0_i32 = arith.constant 0 : i32
    %c0_i32_0 = arith.constant 0 : i32
    %c0_i32_1 = arith.constant 0 : i32
    return %arg0, %c0_i32, %c0_i32_0 : i32, i32, i32
  }
  func.func @transform_1(%arg0: i32) -> (i32, i32) {
    %c0_i32 = arith.constant 0 : i32
    %c0_i32_0 = arith.constant 0 : i32
    %c0_i32_1 = arith.constant 0 : i32
    return %c0_i32, %c0_i32_0 : i32, i32
  }
  func.func @transform_2(%arg0: i32) -> (i32, i32) {
    %c0_i32 = arith.constant 0 : i32
    %c0_i32_0 = arith.constant 0 : i32
    %c0_i32_1 = arith.constant 0 : i32
    return %c0_i32, %c0_i32_0 : i32, i32
  }
  func.func @transform_3(%arg0: i32) -> (i32, i32) {
    %c0_i32 = arith.constant 0 : i32
    %c0_i32_0 = arith.constant 0 : i32
    %c0_i32_1 = arith.constant 0 : i32
    return %c0_i32, %c0_i32_0 : i32, i32
  }
  func.func @transform_4(%arg0: i32) -> (i32, i32) {
    %c0_i32 = arith.constant 0 : i32
    %c0_i32_0 = arith.constant 0 : i32
    %c0_i32_1 = arith.constant 0 : i32
    return %c0_i32, %c0_i32_0 : i32, i32
  }
  func.func @transform_5(%arg0: i32) -> (i32, i32) {
    %c0_i32 = arith.constant 0 : i32
    %c0_i32_0 = arith.constant 0 : i32
    %c0_i32_1 = arith.constant 0 : i32
    return %c0_i32, %c0_i32_0 : i32, i32
  }
  func.func @transform_6(%arg0: i32) -> (i32, i32) {
    %c0_i32 = arith.constant 0 : i32
    %c0_i32_0 = arith.constant 0 : i32
    %c0_i32_1 = arith.constant 0 : i32
    return %c0_i32, %c0_i32_0 : i32, i32
  }
  func.func @transform_7(%arg0: i32) -> (i32, i32) {
    %c0_i32 = arith.constant 0 : i32
    %c0_i32_0 = arith.constant 0 : i32
    %c0_i32_1 = arith.constant 0 : i32
    return %c0_i32, %c0_i32_0 : i32, i32
  }
  func.func @transform_8(%arg0: i32) -> (i32, i32) {
    %c0_i32 = arith.constant 0 : i32
    %c0_i32_0 = arith.constant 0 : i32
    %c0_i32_1 = arith.constant 0 : i32
    return %c0_i32, %c0_i32_0 : i32, i32
  }
  func.func @transform_9(%arg0: i32) -> (i32, i32) {
    %c0_i32 = arith.constant 0 : i32
    %c0_i32_0 = arith.constant 0 : i32
    %c0_i32_1 = arith.constant 0 : i32
    return %c0_i32, %c0_i32_0 : i32, i32
  }
  func.func @transform_10(%arg0: i32) -> (i32, i32) {
    %c0_i32 = arith.constant 0 : i32
    %c0_i32_0 = arith.constant 0 : i32
    %c0_i32_1 = arith.constant 0 : i32
    return %c0_i32, %c0_i32_0 : i32, i32
  }
  func.func @transform_11(%arg0: i32) -> (i32, i32) {
    %c0_i32 = arith.constant 0 : i32
    %c0_i32_0 = arith.constant 0 : i32
    %c0_i32_1 = arith.constant 0 : i32
    return %c0_i32, %c0_i32_0 : i32, i32
  }
  func.func @transform_12(%arg0: i32) -> (i32, i32, i32) {
    %c0_i32 = arith.constant 0 : i32
    %c0_i32_0 = arith.constant 0 : i32
    %c0_i32_1 = arith.constant 0 : i32
    return %arg0, %c0_i32, %c0_i32_0 : i32, i32, i32
  }
  func.func @transform_13(%arg0: i32) -> (i32, i32, i32) {
    %c0_i32 = arith.constant 0 : i32
    %c0_i32_0 = arith.constant 0 : i32
    %c0_i32_1 = arith.constant 0 : i32
    return %arg0, %c0_i32, %c0_i32_0 : i32, i32, i32
  }
}

</mosaic_0001>

<bundles_post_ra>
// kernel: fnrd_forward.1
= control target key start
LH: loop header
LB: loop body
LE: loop exit
PB: predicated region body
PF: predicated region fallthrough
CT: control target
= control target key end

     0   :  { %s2869_s25 = smov 0   ;;  %s3372_s0 = inlined_call_operand.vmem [shape: f32[2,8,256], index: 0, kind: input, shape index: {}]   ;;  %s3373_s1 = inlined_call_operand.vmem [shape: f32[9,256], index: 1, kind: input, shape index: {}]   ;;  %s3374_s2 = inlined_call_operand.vmem [shape: f32[72,8], index: 2, kind: input, shape index: {}]   ;;  %s3375_s3 = inlined_call_operand.vmem [shape: f32[8,1], index: 3, kind: input, shape index: {}]   ;;  %s3376_s4 = inlined_call_operand.vmem [shape: f32[144,8], index: 4, kind: input, shape index: {}]   ;;  %s3377_s5 = inlined_call_operand.vmem [shape: f32[16,1], index: 5, kind: input, shape index: {}]   ;;  %s3378_s6 = inlined_call_operand.vmem [shape: f32[10,16], index: 6, kind: input, shape index: {}]   ;;  %s3379_s7 = inlined_call_operand.vmem [shape: f32[10,1], index: 7, kind: input, shape index: {}]   ;;  %s3380_s8 = inlined_call_operand.vmem [shape: f32[8,256], index: 8, kind: input, shape index: {}]   ;;  %s3381_s9 = inlined_call_operand.vmem [shape: f32[8,256], index: 9, kind: input, shape index: {}]   ;;  %s3382_s10 = inlined_call_operand.vmem [shape: f32[16,256], index: 10, kind: input, shape index: {}]   ;;  %s3383_s11 = inlined_call_operand.vmem [shape: f32[16,256], index: 11, kind: input, shape index: {}]   ;;  %s3384_s12 = inlined_call_operand.vmem [shape: f32[2,10,1], index: 12, kind: output, shape index: {0}]   ;;  %s3385_s13 = inlined_call_operand.vmem [shape: f32[2,1,1], index: 13, kind: output, shape index: {1}]  }
   0x1 LB: > { %s2678_s26 = sadd.s32 4294967295, %s2779_s25   ;;  %p2682_p0 = scmp.ge.s32.totalorder %s2779_s25, 1  ;;  %s2779_s25 = sphi %s2869_s25, %s24_s25  }
   0x2   : > { %p390_p1 = scmp.lt.s32.totalorder %s2779_s25, 3 }
   0x4   : > { %p391_p2 = pnand %p2682_p0, %p390_p1 }
   0x5   : > { %p437_p3 = scmp.lt.s32.totalorder (!%p391_p2), %s2678_s26, 1  ;;  %s2781_s18 = smov (!%p391_p2), 17  }
   0x6   : > { %394 = sbr.rel (%p391_p2) target bundleno = 1330 (0x532), region = 68  ;;  %s2782_s19 = smov (!%p391_p2), 1  }
   0x7   : > { %s2783_s20 = smov (!%p391_p2), 2   ;;  %s2784_s21 = smov (!%p391_p2), 16  }
   0x8   : > { %s2785_s22 = smov (!%p391_p2), 18   ;;  %s2786_s23 = smov (!%p391_p2), 32  }
   0x9   : > { %s2787_s24 = smov (!%p391_p2), 33   ;;  %s2789_s16 = smov (!%p391_p2), 127  }
   0xa   : > { %s2790_s17 = smov (!%p391_p2), 126   ;;  %s3389_s27 = smov (!%p391_p2), 95  }
   0xb   : > { %v479_v0 = vlaneseq  ;;  %s3395_s26 = smov (!%p437_p3, %s2678_s26), 1  ;;  %v452_v2 = vld [vmem:[%s3373_s1] sm:$0xff]  ;;  %v453_v4 = vld [vmem:[%s3373_s1 + $0x8] sm:$0xff]  ;;  %v2695_v30 = vld [vmem:[%s3373_s1 + $0x10] ss:$0 sm:$0xff]  ;;  %vm472_vm0 = vcmask 138240  }
   0xc   : > { %s3386_s29 = sshll.u32 %s3395_s26, 4  ;;  %v2696_v31 = vld [vmem:[%s3373_s1 + $0x18] ss:$0 sm:$0xff]  ;;  %v2794_v62 = vmov 0.0   ;;  %v456_v63 = vld [vmem:[%s3374_s2] sm:$0xff]  ;;  %vm525_vm1 = vcmask 64512  }
   0xd   : > { %v480_v1 = vshrl.u32 %v479_v0, 7  ;;  %s441_s15 = scalar_lea.vmem %s3372_s0, %s3386_s29  ;;  %593 = vmatprep.mubr.f32.mxu0 %v2794_v62  ;;  %667 = vmatprep.mubr.f32.mxu1 %v2794_v62  ;;  %vm503_vm2 = vcmask 7168   ;;  %vm688_vm3 = vcmask 15360   ;;  %vm800_vm4 = vcmask 130048   ;;  %s3387_s28 = smov 94  }
   0xe   : > { %v450_v6 = vld [vmem:[%s441_s15] sm:$0xff]  ;;  %v451_v9 = vld [vmem:[%s441_s15 + $0x8] sm:$0xff]  ;;  %s2788_s15 = smov 34   ;;  %vm1023_vm5 = vcmask 146432   ;;  %vm1135_vm6 = vcmask 261120   ;;  %vm1247_vm7 = vcmask 269312  }
   0xf   : > { %v491_v3 = vsub.s32 1, %v480_v1  ;;  %v481_v5 = vsub.s32 0, %v480_v1  ;;  %468 = vrot.lane.b32.xlu0 %v450_v6, %s2781_s18  ;;  %v676_v8 = vsub.s32 2, %v480_v1  ;;  %v788_v14 = vsub.s32 3, %v480_v1 }
  0x10   : > { %v900_v17 = vsub.s32 4, %v480_v1  ;;  %v1011_v20 = vsub.s32 5, %v480_v1  ;;  %v1123_v23 = vsub.s32 6, %v480_v1  ;;  %v1235_v26 = vsub.s32 7, %v480_v1 }
  0x11   : > { %v492_v7 = vrot.slane %v452_v2, %v491_v3  ;;  %v496_v10 = vrot.slane %v453_v4, %v491_v3  ;;  %v2892_v11 = vrot.slane %v453_v4, %v481_v5  ;;  %v2894_v12 = vrot.slane %v452_v2, %v481_v5 }
  0x12   : > { %v677_v13 = vrot.slane %v452_v2, %v676_v8  ;;  %v681_v15 = vrot.slane %v453_v4, %v676_v8  ;;  %v789_v16 = vrot.slane %v452_v2, %v788_v14  ;;  %v793_v18 = vrot.slane %v453_v4, %v788_v14 }
  0x13   : > { %499 = vrot.lane.b32.xlu1 %v492_v7, %s2782_s19  ;;  %470 = vrot.lane.b32.xlu0 %v451_v9, %s2781_s18  ;;  %v901_v19 = vrot.slane %v452_v2, %v900_v17  ;;  %v905_v21 = vrot.slane %v453_v4, %v900_v17  ;;  %v1012_v22 = vrot.slane %v452_v2, %v1011_v20  ;;  %vm1359_vm8 = vcmask 277504  }
  0x14   : > { %v1016_v24 = vrot.slane %v453_v4, %v1011_v20  ;;  %v1124_v25 = vrot.slane %v452_v2, %v1123_v23  ;;  %v1128_v27 = vrot.slane %v453_v4, %v1123_v23  ;;  %v1236_v28 = vrot.slane %v452_v2, %v1235_v26 }
  0x15   : > { %v1240_v29 = vrot.slane %v453_v4, %v1235_v26  ;;  %v2797_v23 = vmov 0   ;;  %vm520_vm9 = vcmask 1039360   ;;  %vm705_vm10 = vcmask 1031168  }
  0x16   : > { %2771 = vset.pattern.permute.xlu0 %v2797_v23  ;;  %2772 = vset.pattern.permute.xlu1 %v2797_v23  ;;  %vm928_vm11 = vcmask 908288   ;;  %vm817_vm12 = vcmask 916480   ;;  %vm1152_vm13 = vcmask 785408   ;;  %vm1040_vm14 = vcmask 900096  }
  0x17   : > { %501 = vrot.lane.b32.xlu1 %v496_v10, %s2782_s19  ;;  %684 = vrot.lane.b32.xlu0 %v677_v13, %s2783_s20  ;;  %s2791_s19 = smov 112   ;;  %vm1264_vm15 = vcmask 777216  }
  0x1b   : > { %686 = vrot.lane.b32.xlu1 %v681_v15, %s2783_s20  ;;  %796 = vrot.lane.b32.xlu0 %v789_v16, %s2784_s21  ;;  %s2792_s20 = smov 111  }
  0x1f   : > { %798 = vrot.lane.b32.xlu1 %v793_v18, %s2784_s21  ;;  %908 = vrot.lane.b32.xlu0 %v901_v19, %s2781_s18  ;;  %s2793_s21 = smov 110  }
  0x23   : > { %910 = vrot.lane.b32.xlu1 %v905_v21, %s2781_s18  ;;  %1019 = vrot.lane.b32.xlu0 %v1012_v22, %s2785_s22 }
  0x27   : > { %1021 = vrot.lane.b32.xlu1 %v1016_v24, %s2785_s22  ;;  %1131 = vrot.lane.b32.xlu0 %v1124_v25, %s2786_s23  ;;  %s3391_s22 = smov 95  }
  0x2b   : > { %1133 = vrot.lane.b32.xlu1 %v1128_v27, %s2786_s23  ;;  %1243 = vrot.lane.b32.xlu0 %v1236_v28, %s2787_s24  ;;  %v465_v28 = vld [vmem:[%s3375_s3] sm:$0xff] }
  0x2f   : > { %1245 = vrot.lane.b32.xlu1 %v1240_v29, %s2787_s24  ;;  %1355 = vrot.lane.b32.xlu0 %v2695_v30, %s2788_s15  ;;  %s2795_s24 = smov 96  }
  0x33   : > { %1357 = vrot.lane.b32.xlu1 %v2696_v31, %s2788_s15 }
  0x81   : > { %v469_v32 = vpop.permute.xlu0 %468 }
  0x82   : > { %v2906_v33 = vsel %vm472_vm0, 0.0, %v469_v32 }
  0x83   : > { %v487_v42 = vmul.f32 %v2894_v12, %v2906_v33 }
  0x85   : > { %v2908_v34 = vpop.permute.xlu1 %499  ;;  %v471_v36 = vpop.permute.xlu0 %470 }
  0x86   : > { %v508_v35 = vmul.f32 %v2908_v34, %v2906_v33  ;;  %v2914_v37 = vsel %vm472_vm0, %v469_v32, %v471_v36  ;;  %v2917_v38 = vsel %vm472_vm0, %v471_v36, 0.0 }
  0x87   : > { %v488_v41 = vmul.f32 %v2892_v11, %v2914_v37 }
  0x88   : > { %514 = vrot.lane.b32.xlu0 %v508_v35, %s2789_s16 }
  0x89   : > { %v2919_v39 = vpop.permute.xlu1 %501  ;;  %633 = vmatprep.subr.mxu1 %v488_v41  ;;  %v2928_v43 = vpop.permute.xlu0 %684 }
  0x8a   : > { %v510_v40 = vmul.f32 %v2919_v39, %v2917_v38  ;;  %v693_v44 = vmul.f32 %v2928_v43, %v2906_v33  ;;  %634 = vmatpush1.msra.mxu1 %v487_v42  ;;  %v2996_v5 = vsel %vm503_vm2, %v2908_v34, %v2919_v39 }
  0x8b   : > { %2688 = vmatmul.mubr.msk.f32.vlgmr.msra.gmra.mxu1 %vm525_vm1, %v456_v63  ;;  %v509_v8 = vmul.f32 %v2996_v5, %v2914_v37 }
  0x8c   : > { %518 = vrot.lane.b32.xlu1 %v510_v40, %s2789_s16  ;;  %889 = vmatprep.mubr.f32.mxu1 %v2794_v62 }
  0x8d   : > { %v2932_v45 = vpop.permute.xlu1 %686  ;;  %v2938_v47 = vpop.permute.xlu0 %796 }
  0x8e   : > { %v695_v46 = vmul.f32 %v2932_v45, %v2917_v38  ;;  %v805_v48 = vmul.f32 %v2938_v47, %v2906_v33  ;;  %v3000_v6 = vsel %vm688_vm3, %v2928_v43, %v2932_v45  ;;  %vm1376_vm3 = vcmask 769024  }
  0x8f   : > { %v694_v7 = vmul.f32 %v3000_v6, %v2914_v37 }
  0x90   : > { %703 = vrot.lane.b32.xlu0 %v695_v46, %s2790_s17  ;;  %699 = vrot.lane.b32.xlu1 %v693_v44, %s2790_s17 }
  0x91   : > { %v2942_v49 = vpop.permute.xlu1 %798  ;;  %v2948_v51 = vpop.permute.xlu0 %908 }
  0x92   : > { %v807_v50 = vmul.f32 %v2942_v49, %v2917_v38  ;;  %v916_v52 = vmul.f32 %v2948_v51, %v2906_v33  ;;  %v3011_v9 = vsel %vm800_vm4, %v2938_v47, %v2942_v49 }
  0x93   : > { %v806_v14 = vmul.f32 %v3011_v9, %v2914_v37 }
  0x94   : > { %815 = vrot.lane.b32.xlu1 %v807_v50, %s2791_s19  ;;  %811 = vrot.lane.b32.xlu0 %v805_v48, %s2791_s19 }
  0x95   : > { %v2952_v53 = vpop.permute.xlu1 %910  ;;  %v2958_v55 = vpop.permute.xlu0 %1019 }
  0x96   : > { %v918_v54 = vmul.f32 %v2952_v53, %v2917_v38  ;;  %v1028_v56 = vmul.f32 %v2958_v55, %v2906_v33  ;;  %v3016_v10 = vsel %vm472_vm0, %v2948_v51, %v2952_v53 }
  0x97   : > { %v917_v13 = vmul.f32 %v3016_v10, %v2914_v37 }
  0x98   : > { %926 = vrot.lane.b32.xlu0 %v918_v54, %s2792_s20  ;;  %922 = vrot.lane.b32.xlu1 %v916_v52, %s2792_s20 }
  0x99   : > { %v2962_v57 = vpop.permute.xlu1 %1021  ;;  %v2968_v59 = vpop.permute.xlu0 %1131 }
  0x9a   : > { %v1030_v58 = vmul.f32 %v2962_v57, %v2917_v38  ;;  %v1140_v60 = vmul.f32 %v2968_v59, %v2906_v33  ;;  %v3026_v15 = vsel %vm1023_vm5, %v2958_v55, %v2962_v57 }
  0x9b   : > { %v1029_v20 = vmul.f32 %v3026_v15, %v2914_v37 }
  0x9c   : > { %1038 = vrot.lane.b32.xlu1 %v1030_v58, %s2793_s21  ;;  %1034 = vrot.lane.b32.xlu0 %v1028_v56, %s2793_s21  ;;  %v457_v56 = vld [vmem:[%s3374_s2 + $0x8] sm:$0xff] }
  0x9d   : > { %v2972_v61 = vpop.permute.xlu1 %1133  ;;  %v2985_v1 = vpop.permute.xlu0 %1243 }
  0x9e   : > { %v1142_v0 = vmul.f32 %v2972_v61, %v2917_v38  ;;  %v1252_v2 = vmul.f32 %v2985_v1, %v2906_v33  ;;  %v3030_v16 = vsel %vm1135_vm6, %v2968_v59, %v2972_v61 }
  0x9f   : > { %v1141_v19 = vmul.f32 %v3030_v16, %v2914_v37 }
  0xa0   : > { %1150 = vrot.lane.b32.xlu0 %v1142_v0, %s2795_s24  ;;  %1146 = vrot.lane.b32.xlu1 %v1140_v60, %s2795_s24 }
  0xa1   : > { %v2989_v3 = vpop.permute.xlu1 %1245  ;;  %v3032_v17 = vpop.permute.xlu0 %1355 }
  0xa2   : > { %v1254_v4 = vmul.f32 %v2989_v3, %v2917_v38  ;;  %v3044_v21 = vsel %vm1247_vm7, %v2985_v1, %v2989_v3  ;;  %v1364_v26 = vmul.f32 %v3032_v17, %v2906_v33 }
  0xa3   : > { %v1253_v24 = vmul.f32 %v3044_v21, %v2914_v37 }
  0xa4   : > { %1262 = vrot.lane.b32.xlu1 %v1254_v4, %s3389_s27  ;;  %1258 = vrot.lane.b32.xlu0 %v1252_v2, %s3389_s27 }
  0xa5   : > { %v3034_v18 = vpop.permute.xlu1 %1357 }
  0xa6   : > { %v3048_v22 = vsel %vm1359_vm8, %v3032_v17, %v3034_v18  ;;  %v1366_v27 = vmul.f32 %v3034_v18, %v2917_v38 }
  0xa7   : > { %v1365_v25 = vmul.f32 %v3048_v22, %v2914_v37 }
  0xa8   : > { %701 = vrot.lane.b32.xlu1 %v694_v7, %s2790_s17  ;;  %516 = vrot.lane.b32.xlu0 %v509_v8, %s2789_s16  ;;  %v458_v8 = vld [vmem:[%s3374_s2 + $0x10] sm:$0xff] }
  0xac   : > { %924 = vrot.lane.b32.xlu1 %v917_v13, %s2792_s20  ;;  %813 = vrot.lane.b32.xlu0 %v806_v14, %s2791_s19  ;;  %v459_v13 = vld [vmem:[%s3374_s2 + $0x18] sm:$0xff] }
  0xb0   : > { %1148 = vrot.lane.b32.xlu1 %v1141_v19, %s2795_s24  ;;  %1036 = vrot.lane.b32.xlu0 %v1029_v20, %s2793_s21 }
  0xb4   : > { %1260 = vrot.lane.b32.xlu0 %v1253_v24, %s3389_s27  ;;  %1372 = vrot.lane.b32.xlu1 %v1365_v25, %s3387_s28 }
  0xb8   : > { %1374 = vrot.lane.b32.xlu0 %v1366_v27, %s3387_s28  ;;  %1370 = vrot.lane.b32.xlu1 %v1364_v26, %s3387_s28  ;;  %v460_v26 = vld [vmem:[%s3374_s2 + $0x20] sm:$0xff]  ;;  %v461_v27 = vld [vmem:[%s3374_s2 + $0x28] sm:$0xff] }
  0xbc   : > { %1459 = vperm.xlu0 %2771, %v465_v28  }
  0xfa   : > { %v515_v29 = vpop.permute.xlu0 %514 }
  0xfe   : > { %v519_v30 = vpop.permute.xlu1 %518 }
 0x102   : > { %v700_v31 = vpop.permute.xlu1 %699  ;;  %v704_v32 = vpop.permute.xlu0 %703 }
 0x106   : > { %v816_v35 = vpop.permute.xlu1 %815  ;;  %v812_v36 = vpop.permute.xlu0 %811 }
 0x10a   : > { %v923_v37 = vpop.permute.xlu1 %922  ;;  %v927_v33 = vpop.permute.xlu0 %926 }
 0x10e   : > { %v1039_v40 = vpop.permute.xlu1 %1038  ;;  %v1035_v41 = vpop.permute.xlu0 %1034 }
 0x112   : > { %v1147_v38 = vpop.permute.xlu1 %1146  ;;  %v1151_v42 = vpop.permute.xlu0 %1150 }
 0x116   : > { %v1263_v44 = vpop.permute.xlu1 %1262  ;;  %v1259_v46 = vpop.permute.xlu0 %1258 }
 0x11a   : > { %v702_v48 = vpop.permute.xlu1 %701  ;;  %v517_v50 = vpop.permute.xlu0 %516 }
 0x11b   : > { %v522_v52 = vsel %vm520_vm9, %v517_v50, %v519_v30  ;;  %v521_v54 = vsel %vm520_vm9, %v515_v29, %v517_v50  ;;  %v707_v58 = vsel %vm705_vm10, %v702_v48, %v704_v32  ;;  %v706_v60 = vsel %vm705_vm10, %v700_v31, %v702_v48 }
 0x11c   : > { %559 = vmatprep.subr.mxu0 %v522_v52 }
 0x11d   : > { %560 = vmatpush1.msra.mxu0 %v521_v54 }
 0x11e   : > { %v925_v63 = vpop.permute.xlu1 %924  ;;  %2687 = vmatmul.mubr.msk.f32.vlgmr.msra.gmra.mxu0 %vm525_vm1, %v457_v56  ;;  %743 = vmatprep.subr.mxu0 %v707_v58  ;;  %v814_v0 = vpop.permute.xlu0 %813 }
 0x11f   : > { %v818_v2 = vsel %vm817_vm12, %v812_v36, %v814_v0  ;;  %744 = vmatpush1.msra.mxu0 %v706_v60  ;;  %v819_v4 = vsel %vm817_vm12, %v814_v0, %v816_v35  ;;  %v930_v7 = vsel %vm928_vm11, %v925_v63, %v927_v33  ;;  %777 = vmatprep.mubr.f32.mxu0 %v2794_v62  ;;  %v462_v35 = vld [vmem:[%s3374_s2 + $0x30] sm:$0xff]  ;;  %v463_v36 = vld [vmem:[%s3374_s2 + $0x38] sm:$0xff] }
 0x120   : > { %855 = vmatprep.subr.mxu1 %v819_v4  ;;  %966 = vmatprep.subr.mxu0 %v930_v7  ;;  %v929_v14 = vsel %vm928_vm11, %v923_v37, %v925_v63 }
 0x121   : > { %856 = vmatpush1.msra.mxu1 %v818_v2 }
 0x122   : > { %v1149_v19 = vpop.permute.xlu1 %1148  ;;  %2689 = vmatmul.mubr.msk.f32.vlgmr.msra.gmra.mxu0 %vm525_vm1, %v458_v8  ;;  %2690 = vmatmul.mubr.msk.f32.vlgmr.msra.gmra.mxu1 %vm525_vm1, %v459_v13  ;;  %v1037_v20 = vpop.permute.xlu0 %1036 }
 0x123   : > { %967 = vmatpush1.msra.mxu0 %v929_v14  ;;  %v1041_v23 = vsel %vm1040_vm14, %v1035_v41, %v1037_v20  ;;  %v1042_v24 = vsel %vm1040_vm14, %v1037_v20, %v1039_v40  ;;  %v1154_v25 = vsel %vm1152_vm13, %v1149_v19, %v1151_v42  ;;  %1000 = vmatprep.mubr.f32.mxu0 %v2794_v62 }
 0x124   : > { %1078 = vmatprep.subr.mxu1 %v1042_v24  ;;  %1190 = vmatprep.subr.mxu0 %v1154_v25  ;;  %v1153_v28 = vsel %vm1152_vm13, %v1147_v38, %v1149_v19  ;;  %v464_v38 = vld [vmem:[%s3374_s2 + $0x40] sm:$0xff] }
 0x125   : > { %1079 = vmatpush1.msra.mxu1 %v1041_v23  ;;  %1112 = vmatprep.mubr.f32.mxu1 %v2794_v62 }
 0x126   : > { %v1373_v29 = vpop.permute.xlu1 %1372  ;;  %2691 = vmatmul.mubr.msk.f32.vlgmr.msra.gmra.mxu0 %vm525_vm1, %v460_v26  ;;  %v1261_v30 = vpop.permute.xlu0 %1260  ;;  %2692 = vmatmul.mubr.msk.f32.vlgmr.msra.gmra.mxu1 %vm525_vm1, %v461_v27 }
 0x127   : > { %1191 = vmatpush1.msra.mxu0 %v1153_v28  ;;  %v1265_v31 = vsel %vm1264_vm15, %v1259_v46, %v1261_v30  ;;  %v1266_v32 = vsel %vm1264_vm15, %v1261_v30, %v1263_v44  ;;  %1224 = vmatprep.mubr.f32.mxu0 %v2794_v62 }
 0x128   : > { %1302 = vmatprep.subr.mxu1 %v1266_v32  ;;  %1336 = vmatprep.mubr.f32.mxu1 %v2794_v62 }
 0x129   : > { %1303 = vmatpush1.msra.mxu1 %v1265_v31 }
 0x12a   : > { %v1371_v37 = vpop.permute.xlu1 %1370  ;;  %2693 = vmatmul.mubr.msk.f32.vlgmr.msra.gmra.mxu0 %vm525_vm1, %v462_v35  ;;  %v1375_v33 = vpop.permute.xlu0 %1374  ;;  %2694 = vmatmul.mubr.msk.f32.vlgmr.msra.gmra.mxu1 %vm525_vm1, %v463_v36 }
 0x12b   : > { %v1377_v40 = vsel %vm1376_vm3, %v1371_v37, %v1373_v29  ;;  %v1378_v41 = vsel %vm1376_vm3, %v1373_v29, %v1375_v33  ;;  %1448 = vmatprep.mubr.f32.mxu0 %v2794_v62  ;;  %1586 = vmatprep.mubr.f32.mxu1 %v2794_v62 }
 0x12c   : > { %1414 = vmatprep.subr.mxu0 %v1378_v41 }
 0x12d   : > { %1415 = vmatpush1.msra.mxu0 %v1377_v40 }
 0x12e   : > { %2697 = vmatmul.mubr.msk.f32.vlgmr.msra.gmra.mxu0 %vm525_vm1, %v464_v38  ;;  %v2517_v38 = vld [vmem:[%s3381_s9] sm:$0xff] }
 0x12f   : > { %1669 = vmatprep.mubr.f32.mxu0 %v2794_v62 }
 0x137   : > { %v1460_v31 = vpop.permute.xlu0 %1459 }
 0x14b   : > { %v669_v42 = vpop.f32.mrf.mxu1 }
 0x14d   : > { %v671_v46 = vpop.f32.mrf.mxu1 }
 0x1de   : > { %v595_v44 = vpop.f32.mrf.mxu0 }
 0x1df   : > { %v670_v50 = vadd.f32 %v669_v42, %v595_v44  ;;  %v2525_v42 = vld [vmem:[%s3380_s8] sm:$0xff] }
 0x1e0   : > { %v597_v48 = vpop.f32.mrf.mxu0 }
 0x1e1   : > { %v672_v56 = vadd.f32 %v671_v46, %v597_v48  ;;  %v2518_v48 = vld [vmem:[%s3381_s9 + $0x8] sm:$0xff] }
 0x1e2   : > { %v779_v52 = vpop.f32.mrf.mxu0  ;;  %v891_v54 = vpop.f32.mrf.mxu1 }
 0x1e3   : > { %v784_v58 = vadd.f32 %v779_v52, %v670_v50  ;;  %v2526_v50 = vld [vmem:[%s3380_s8 + $0x8] sm:$0xff] }
 0x1e4   : > { %v781_v60 = vpop.f32.mrf.mxu0  ;;  %v893_v63 = vpop.f32.mrf.mxu1 }
 0x1e5   : > { %v896_v0 = vadd.f32 %v891_v54, %v784_v58  ;;  %v785_v2 = vadd.f32 %v781_v60, %v672_v56 }
 0x1e6   : > { %v1002_v4 = vpop.f32.mrf.mxu0  ;;  %v1114_v13 = vpop.f32.mrf.mxu1 }
 0x1e7   : > { %v897_v7 = vadd.f32 %v893_v63, %v785_v2  ;;  %v1007_v8 = vadd.f32 %v1002_v4, %v896_v0 }
 0x1e8   : > { %v1004_v14 = vpop.f32.mrf.mxu0  ;;  %v1116_v23 = vpop.f32.mrf.mxu1 }
 0x1e9   : > { %v1119_v19 = vadd.f32 %v1114_v13, %v1007_v8  ;;  %v1008_v20 = vadd.f32 %v1004_v14, %v897_v7 }
 0x1ea   : > { %v1226_v24 = vpop.f32.mrf.mxu0  ;;  %v1338_v27 = vpop.f32.mrf.mxu1 }
 0x1eb   : > { %v1120_v25 = vadd.f32 %v1116_v23, %v1008_v20  ;;  %v1231_v26 = vadd.f32 %v1226_v24, %v1119_v19 }
 0x1ec   : > { %v1228_v28 = vpop.f32.mrf.mxu0  ;;  %v1340_v32 = vpop.f32.mrf.mxu1 }
 0x1ed   : > { %v1343_v29 = vadd.f32 %v1338_v27, %v1231_v26  ;;  %v1232_v30 = vadd.f32 %v1228_v28, %v1120_v25 }
 0x1ee   : > { %v1450_v35 = vpop.f32.mrf.mxu0 }
 0x1ef   : > { %v1344_v36 = vadd.f32 %v1340_v32, %v1232_v30  ;;  %v1455_v37 = vadd.f32 %v1450_v35, %v1343_v29 }
 0x1f0   : > { %v1452_v33 = vpop.f32.mrf.mxu0 }
 0x1f1   : > { %v1456_v40 = vadd.f32 %v1452_v33, %v1344_v36  ;;  %v1462_v41 = vadd.f32 %v1460_v31, %v1455_v37  ;;  %v1468_v37 = vld [vmem:[%s3376_s4 + $0x10] sm:$0xff] }
 0x1f3   : > { %v1463_v44 = vadd.f32 %v1460_v31, %v1456_v40  ;;  %v1464_v46 = vmax.f32 %v1462_v41, 0.0  ;;  %v1469_v41 = vld [vmem:[%s3376_s4 + $0x18] sm:$0xff] }
 0x1f5   : > { %v1465_v52 = vmax.f32 %v1463_v44, 0.0  ;;  %1488 = vrot.lane.b32.xlu1 %v1464_v46, %s2781_s18  ;;  %vm2519_vm5 = vcmp.gt.f32.partialorder %v1464_v46, %v2517_v38  ;;  %vm2527_vm6 = vcmp.lt.f32.partialorder %v1464_v46, %v2525_v42  ;;  %v1470_v46 = vld [vmem:[%s3376_s4 + $0x20] sm:$0xff] }
 0x1f6   : > { %v2718_v54 = vsel %vm2519_vm5, 1.0, %v2794_v62  ;;  %v2720_v56 = vsel %vm2527_vm6, 1.0, %v2794_v62 }
 0x1f7   : > { %vm2520_vm7 = vcmp.gt.f32.partialorder %v1465_v52, %v2518_v48  ;;  %vm2528_vm8 = vcmp.lt.f32.partialorder %v1465_v52, %v2526_v50  ;;  %v2533_v63 = vadd.f32 %v2720_v56, %v2718_v54 }
 0x1f8   : > { %v2719_v58 = vsel %vm2520_vm7, 1.0, %v2794_v62  ;;  %v2721_v60 = vsel %vm2528_vm8, 1.0, %v2794_v62 }
 0x1f9   : > { %1490 = vrot.lane.b32.xlu1 %v1465_v52, %s2781_s18  ;;  %v2534_v0 = vadd.f32 %v2721_v60, %v2719_v58  ;;  %v1471_v58 = vld [vmem:[%s3376_s4 + $0x28] sm:$0xff]  ;;  %v1472_v60 = vld [vmem:[%s3376_s4 + $0x30] sm:$0xff] }
 0x1fb   : > { %v3141_v2 = vadd.f32 %v2534_v0, %v2533_v63 }
 0x267   : > { %v1489_v4 = vpop.permute.xlu1 %1488 }
 0x268   : > { %v1496_v7 = vsel %vm472_vm0, 0.0, %v1489_v4 }
 0x269   : > { %v1682_v8 = vmul.f32 %v1496_v7, %v2928_v43  ;;  %v1500_v13 = vmul.f32 %v1496_v7, %v2908_v34  ;;  %v1888_v20 = vmul.f32 %v1496_v7, %v2948_v51  ;;  %v1785_v23 = vmul.f32 %v1496_v7, %v2938_v47  ;;  %v1466_v43 = vld [vmem:[%s3376_s4] sm:$0xff] }
 0x26a   : > { %v1498_v34 = vmul.f32 %v1496_v7, %v2894_v12  ;;  %v1991_v51 = vmul.f32 %v1496_v7, %v2958_v55  ;;  %v2094_v12 = vmul.f32 %v1496_v7, %v2968_v59  ;;  %v2197_v55 = vmul.f32 %v1496_v7, %v2985_v1 }
 0x26b   : > { %1688 = vrot.lane.b32.xlu1 %v1682_v8, %s2790_s17  ;;  %1506 = vrot.lane.b32.xlu0 %v1500_v13, %s2789_s16  ;;  %v1491_v14 = vpop.permute.xlu1 %1490  ;;  %v1474_v8 = vld [vmem:[%s3376_s4 + $0x40] sm:$0xff] }
 0x26c   : > { %v1492_v19 = vsel %vm472_vm0, %v1489_v4, %v1491_v14  ;;  %v1497_v25 = vsel %vm472_vm0, %v1491_v14, 0.0 }
 0x26d   : > { %v1499_v24 = vmul.f32 %v1492_v19, %v2892_v11  ;;  %v1502_v47 = vmul.f32 %v1497_v25, %v2919_v39  ;;  %v1467_v11 = vld [vmem:[%s3376_s4 + $0x8] sm:$0xff]  ;;  %v1501_v26 = vmul.f32 %v1492_v19, %v2996_v5  ;;  %v1683_v39 = vmul.f32 %v1492_v19, %v3000_v6 }
 0x26e   : > { %v1787_v59 = vmul.f32 %v1497_v25, %v2942_v49  ;;  %v1684_v5 = vmul.f32 %v1497_v25, %v2932_v45  ;;  %v1889_v27 = vmul.f32 %v1492_v19, %v3016_v10  ;;  %v1786_v28 = vmul.f32 %v1492_v19, %v3011_v9 }
 0x26f   : > { %1894 = vrot.lane.b32.xlu1 %v1888_v20, %s2792_s20  ;;  %1791 = vrot.lane.b32.xlu0 %v1785_v23, %s2791_s19  ;;  %v1993_v1 = vmul.f32 %v1497_v25, %v2962_v57  ;;  %v1890_v6 = vmul.f32 %v1497_v25, %v2952_v53  ;;  %v2095_v45 = vmul.f32 %v1492_v19, %v3030_v16 }
 0x270   : > { %1635 = vmatprep.subr.mxu0 %v1499_v24  ;;  %v1992_v49 = vmul.f32 %v1492_v19, %v3026_v15  ;;  %v2199_v9 = vmul.f32 %v1497_v25, %v2989_v3  ;;  %v2096_v10 = vmul.f32 %v1497_v25, %v2972_v61  ;;  %v2301_v53 = vmul.f32 %v1492_v19, %v3048_v22  ;;  %v1485_v61 = vld [vmem:[%s3377_s5 + $0x8] sm:$0xff]  ;;  %v1484_v3 = vld [vmem:[%s3377_s5] sm:$0xff] }
 0x271   : > { %1636 = vmatpush1.msra.mxu0 %v1498_v34  ;;  %v2198_v57 = vmul.f32 %v1492_v19, %v3044_v21  ;;  %v2300_v15 = vmul.f32 %v1496_v7, %v3032_v17  ;;  %v2302_v16 = vmul.f32 %v1497_v25, %v3034_v18  ;;  %v1473_v7 = vld [vmem:[%s3376_s4 + $0x38] sm:$0xff]  ;;  %v1475_v24 = vld [vmem:[%s3376_s4 + $0x48] sm:$0xff]  ;;  %v1476_v25 = vld [vmem:[%s3376_s4 + $0x50] sm:$0xff] }
 0x272   : > { %2700 = vmatmul.mubr.msk.f32.vlgmr.msra.gmra.mxu0 %vm525_vm1, %v1466_v43 }
 0x273   : > { %1997 = vrot.lane.b32.xlu0 %v1991_v51, %s2793_s21  ;;  %1510 = vrot.lane.b32.xlu1 %v1502_v47, %s2789_s16  ;;  %v1477_v47 = vld [vmem:[%s3376_s4 + $0x58] sm:$0xff] }
 0x274   : > { %1675 = vmatprep.mubr.f32.mxu0 %v2794_v62 }
 0x276   : > { %2701 = vmatmul.mubr.msk.f32.gmra.mxu0 %vm525_vm1, %v1467_v11  ;;  %v1478_v11 = vld [vmem:[%s3376_s4 + $0x60] sm:$0xff] }
 0x277   : > { %2100 = vrot.lane.b32.xlu1 %v2094_v12, %s2795_s24  ;;  %1508 = vrot.lane.b32.xlu0 %v1501_v26, %s2789_s16  ;;  %s3392_s16 = smov 94  }
 0x278   : > { %1871 = vmatprep.mubr.f32.mxu0 %v2794_v62 }
 0x27b   : > { %1690 = vrot.lane.b32.xlu1 %v1683_v39, %s2790_s17  ;;  %2203 = vrot.lane.b32.xlu0 %v2197_v55, %s3391_s22 }
 0x27f   : > { %1795 = vrot.lane.b32.xlu1 %v1787_v59, %s2791_s19  ;;  %1692 = vrot.lane.b32.xlu0 %v1684_v5, %s2790_s17  ;;  %v1479_v5 = vld [vmem:[%s3376_s4 + $0x68] sm:$0xff] }
 0x283   : > { %1896 = vrot.lane.b32.xlu1 %v1889_v27, %s2792_s20  ;;  %1793 = vrot.lane.b32.xlu0 %v1786_v28, %s2791_s19  ;;  %v1480_v27 = vld [vmem:[%s3376_s4 + $0x70] sm:$0xff]  ;;  %s3393_s19 = sshll.u32 %s3395_s26, 4 }
 0x287   : > { %2001 = vrot.lane.b32.xlu1 %v1993_v1, %s2793_s21  ;;  %1898 = vrot.lane.b32.xlu0 %v1890_v6, %s2792_s20 }
 0x28b   : > { %2102 = vrot.lane.b32.xlu1 %v2095_v45, %s2795_s24  ;;  %1999 = vrot.lane.b32.xlu0 %v1992_v49, %s2793_s21  ;;  %v1481_v49 = vld [vmem:[%s3376_s4 + $0x78] sm:$0xff] }
 0x28f   : > { %2207 = vrot.lane.b32.xlu1 %v2199_v9, %s3391_s22  ;;  %2104 = vrot.lane.b32.xlu0 %v2096_v10, %s2795_s24  ;;  %v1482_v9 = vld [vmem:[%s3376_s4 + $0x80] sm:$0xff]  ;;  %v1483_v10 = vld [vmem:[%s3376_s4 + $0x88] sm:$0xff]  ;;  %s446_s24 = scalar_lea.vmem %s3384_s12, %s3393_s19 }
 0x293   : > { %2308 = vrot.lane.b32.xlu1 %v2301_v53, %s3392_s16  ;;  %2205 = vrot.lane.b32.xlu0 %v2198_v57, %s3391_s22  ;;  %s449_s22 = scalar_lea.vmem %s3385_s13, %s3395_s26 }
 0x297   : > { %2306 = vrot.lane.b32.xlu1 %v2300_v15, %s3392_s16  ;;  %2310 = vrot.lane.b32.xlu0 %v2302_v16, %s3392_s16 }
 0x29b   : > { %2410 = vperm.xlu0 %2771, %v1485_v61   ;;  %2405 = vperm.xlu1 %2772, %v1484_v3  }
 0x2dd   : > { %v1507_v21 = vpop.permute.xlu0 %1506  ;;  %v1689_v22 = vpop.permute.xlu1 %1688 }
 0x2e1   : > { %v1792_v29 = vpop.permute.xlu0 %1791  ;;  %v1895_v17 = vpop.permute.xlu1 %1894 }
 0x2e5   : > { %v1998_v30 = vpop.permute.xlu0 %1997  ;;  %v1511_v18 = vpop.permute.xlu1 %1510 }
 0x2e9   : > { %v1509_v31 = vpop.permute.xlu0 %1508  ;;  %v3212_v32 = vpop.permute.xlu1 %2100 }
 0x2ea   : > { %v1512_v35 = vsel %vm520_vm9, %v1507_v21, %v1509_v31  ;;  %v1513_v36 = vsel %vm520_vm9, %v1509_v31, %v1511_v18 }
 0x2eb   : > { %1552 = vmatprep.subr.mxu1 %v1513_v36 }
 0x2ec   : > { %1553 = vmatpush1.msra.mxu1 %v1512_v35 }
 0x2ed   : > { %v3219_v33 = vpop.permute.xlu0 %2203  ;;  %2698 = vmatmul.mubr.msk.f32.vlgmr.msra.gmra.mxu1 %vm525_vm1, %v1468_v37  ;;  %v1691_v40 = vpop.permute.xlu1 %1690 }
 0x2ee   : > { %1592 = vmatprep.mubr.f32.mxu1 %v2794_v62  ;;  %v1694_v48 = vsel %vm705_vm10, %v1689_v22, %v1691_v40 }
 0x2f1   : > { %v1693_v38 = vpop.permute.xlu0 %1692  ;;  %2699 = vmatmul.mubr.msk.f32.gmra.mxu1 %vm525_vm1, %v1469_v41  ;;  %v1796_v42 = vpop.permute.xlu1 %1795 }
 0x2f2   : > { %v1695_v44 = vsel %vm705_vm10, %v1691_v40, %v1693_v38  ;;  %1768 = vmatprep.mubr.f32.mxu1 %v2794_v62 }
 0x2f3   : > { %1734 = vmatprep.subr.mxu1 %v1695_v44 }
 0x2f4   : > { %1735 = vmatpush1.msra.mxu1 %v1694_v48 }
 0x2f5   : > { %v1794_v50 = vpop.permute.xlu0 %1793  ;;  %2702 = vmatmul.mubr.msk.f32.vlgmr.msra.gmra.mxu1 %vm525_vm1, %v1470_v46  ;;  %v1897_v52 = vpop.permute.xlu1 %1896 }
 0x2f6   : > { %v1797_v54 = vsel %vm817_vm12, %v1792_v29, %v1794_v50  ;;  %v1798_v56 = vsel %vm817_vm12, %v1794_v50, %v1796_v42  ;;  %1774 = vmatprep.mubr.f32.mxu1 %v2794_v62  ;;  %v1900_v13 = vsel %vm928_vm11, %v1895_v17, %v1897_v52 }
 0x2f7   : > { %1837 = vmatprep.subr.mxu0 %v1798_v56 }
 0x2f8   : > { %1838 = vmatpush1.msra.mxu0 %v1797_v54 }
 0x2f9   : > { %v1899_v63 = vpop.permute.xlu0 %1898  ;;  %2703 = vmatmul.mubr.msk.f32.gmra.mxu1 %vm525_vm1, %v1471_v58  ;;  %2704 = vmatmul.mubr.msk.f32.vlgmr.msra.gmra.mxu0 %vm525_vm1, %v1472_v60  ;;  %v2002_v0 = vpop.permute.xlu1 %2001 }
 0x2fa   : > { %v1901_v4 = vsel %vm928_vm11, %v1897_v52, %v1899_v63  ;;  %1877 = vmatprep.mubr.f32.mxu0 %v2794_v62  ;;  %1974 = vmatprep.mubr.f32.mxu1 %v2794_v62 }
 0x2fb   : > { %1940 = vmatprep.subr.mxu1 %v1901_v4 }
 0x2fc   : > { %1941 = vmatpush1.msra.mxu1 %v1900_v13 }
 0x2fd   : > { %v2000_v14 = vpop.permute.xlu0 %1999  ;;  %2705 = vmatmul.mubr.msk.f32.gmra.mxu0 %vm525_vm1, %v1473_v7  ;;  %2706 = vmatmul.mubr.msk.f32.vlgmr.msra.gmra.mxu1 %vm525_vm1, %v1474_v8  ;;  %v2103_v19 = vpop.permute.xlu1 %2102 }
 0x2fe   : > { %v2003_v20 = vsel %vm1040_vm14, %v1998_v30, %v2000_v14  ;;  %v2004_v23 = vsel %vm1040_vm14, %v2000_v14, %v2002_v0  ;;  %1980 = vmatprep.mubr.f32.mxu1 %v2794_v62  ;;  %2077 = vmatprep.mubr.f32.mxu0 %v2794_v62  ;;  %v2106_v12 = vsel %vm1152_vm13, %v3212_v32, %v2103_v19 }
 0x2ff   : > { %2043 = vmatprep.subr.mxu0 %v2004_v23 }
 0x300   : > { %2044 = vmatpush1.msra.mxu0 %v2003_v20 }
 0x301   : > { %v2105_v34 = vpop.permute.xlu0 %2104  ;;  %2707 = vmatmul.mubr.msk.f32.gmra.mxu1 %vm525_vm1, %v1475_v24  ;;  %2708 = vmatmul.mubr.msk.f32.vlgmr.msra.gmra.mxu0 %vm525_vm1, %v1476_v25  ;;  %v2208_v43 = vpop.permute.xlu1 %2207 }
 0x302   : > { %v2107_v51 = vsel %vm1152_vm13, %v2103_v19, %v2105_v34  ;;  %2083 = vmatprep.mubr.f32.mxu0 %v2794_v62  ;;  %2180 = vmatprep.mubr.f32.mxu1 %v2794_v62 }
 0x303   : > { %2146 = vmatprep.subr.mxu1 %v2107_v51 }
 0x304   : > { %2147 = vmatpush1.msra.mxu1 %v2106_v12 }
 0x305   : > { %v2206_v26 = vpop.permute.xlu0 %2205  ;;  %2709 = vmatmul.mubr.msk.f32.gmra.mxu0 %vm525_vm1, %v1477_v47  ;;  %2710 = vmatmul.mubr.msk.f32.vlgmr.msra.gmra.mxu1 %vm525_vm1, %v1478_v11  ;;  %v2309_v39 = vpop.permute.xlu1 %2308 }
 0x306   : > { %v2209_v55 = vsel %vm1264_vm15, %v3219_v33, %v2206_v26  ;;  %v2210_v59 = vsel %vm1264_vm15, %v2206_v26, %v2208_v43  ;;  %2186 = vmatprep.mubr.f32.mxu1 %v2794_v62  ;;  %2283 = vmatprep.mubr.f32.mxu0 %v2794_v62  ;;  %vm2515_vm15 = vcmask 1024  }
 0x307   : > { %2249 = vmatprep.subr.mxu0 %v2210_v59 }
 0x308   : > { %2250 = vmatpush1.msra.mxu0 %v2209_v55 }
 0x309   : > { %v2311_v28 = vpop.permute.xlu0 %2310  ;;  %2711 = vmatmul.mubr.msk.f32.gmra.mxu1 %vm525_vm1, %v1479_v5  ;;  %2712 = vmatmul.mubr.msk.f32.vlgmr.msra.gmra.mxu0 %vm525_vm1, %v1480_v27  ;;  %v2307_v1 = vpop.permute.xlu1 %2306 }
 0x30a   : > { %v2312_v6 = vsel %vm1376_vm3, %v2307_v1, %v2309_v39  ;;  %v2313_v45 = vsel %vm1376_vm3, %v2309_v39, %v2311_v28  ;;  %2289 = vmatprep.mubr.f32.mxu0 %v2794_v62  ;;  %2386 = vmatprep.mubr.f32.mxu1 %v2794_v62 }
 0x30b   : > { %2352 = vmatprep.subr.mxu1 %v2313_v45 }
 0x30c   : > { %2353 = vmatpush1.msra.mxu1 %v2312_v6 }
 0x30d   : > { %2713 = vmatmul.mubr.msk.f32.gmra.mxu0 %vm525_vm1, %v1481_v49  ;;  %2714 = vmatmul.mubr.msk.f32.vlgmr.msra.gmra.mxu1 %vm525_vm1, %v1482_v9 }
 0x30e   : > { %2392 = vmatprep.mubr.f32.mxu1 %v2794_v62 }
 0x311   : > { %2715 = vmatmul.mubr.msk.f32.gmra.mxu1 %vm525_vm1, %v1483_v10 }
 0x316   : > { %v2406_v59 = vpop.permute.xlu1 %2405 }
 0x332   : > { %v1671_v53 = vpop.f32.mrf.mxu0 }
 0x334   : > { %v1673_v16 = vpop.f32.mrf.mxu0 }
 0x336   : > { %v1677_v3 = vpop.f32.mrf.mxu0 }
 0x338   : > { %v1679_v29 = vpop.f32.mrf.mxu0 }
 0x3ad   : > { %v1588_v57 = vpop.f32.mrf.mxu1 }
 0x3ae   : > { %v1672_v40 = vadd.f32 %v1671_v53, %v1588_v57 }
 0x3af   : > { %v1590_v15 = vpop.f32.mrf.mxu1 }
 0x3b0   : > { %v1674_v42 = vadd.f32 %v1673_v16, %v1590_v15 }
 0x3b1   : > { %v1594_v61 = vpop.f32.mrf.mxu1 }
 0x3b2   : > { %v1678_v50 = vadd.f32 %v1677_v3, %v1594_v61 }
 0x3b3   : > { %v1596_v21 = vpop.f32.mrf.mxu1 }
 0x3b4   : > { %v1680_v60 = vadd.f32 %v1679_v29, %v1596_v21  ;;  %v2535_v29 = vld [vmem:[%s3383_s11] sm:$0xff] }
 0x3b5   : > { %v1770_v22 = vpop.f32.mrf.mxu1 }
 0x3b6   : > { %v1781_v44 = vadd.f32 %v1770_v22, %v1672_v40 }
 0x3b7   : > { %v1772_v17 = vpop.f32.mrf.mxu1 }
 0x3b8   : > { %v1782_v52 = vadd.f32 %v1772_v17, %v1674_v42  ;;  %v2551_v17 = vld [vmem:[%s3382_s10] sm:$0xff] }
 0x3b9   : > { %v1776_v30 = vpop.f32.mrf.mxu1  ;;  %v1873_v18 = vpop.f32.mrf.mxu0 }
 0x3ba   : > { %v1884_v54 = vadd.f32 %v1873_v18, %v1781_v44  ;;  %v1783_v63 = vadd.f32 %v1776_v30, %v1678_v50  ;;  %v2411_v30 = vpop.permute.xlu0 %2410  ;;  %v2538_v44 = vld [vmem:[%s3383_s11 + $0x18] sm:$0xff] }
 0x3bb   : > { %v1778_v31 = vpop.f32.mrf.mxu1  ;;  %v1875_v32 = vpop.f32.mrf.mxu0 }
 0x3bc   : > { %v1885_v0 = vadd.f32 %v1875_v32, %v1782_v52  ;;  %v1784_v13 = vadd.f32 %v1778_v31, %v1680_v60  ;;  %v2536_v31 = vld [vmem:[%s3383_s11 + $0x8] sm:$0xff] }
 0x3bd   : > { %v1879_v35 = vpop.f32.mrf.mxu0  ;;  %v1976_v36 = vpop.f32.mrf.mxu1 }
 0x3be   : > { %v1987_v4 = vadd.f32 %v1976_v36, %v1884_v54  ;;  %v1886_v14 = vadd.f32 %v1879_v35, %v1783_v63 }
 0x3bf   : > { %v1881_v37 = vpop.f32.mrf.mxu0  ;;  %v1978_v33 = vpop.f32.mrf.mxu1 }
 0x3c0   : > { %v1988_v19 = vadd.f32 %v1978_v33, %v1885_v0  ;;  %v1887_v25 = vadd.f32 %v1881_v37, %v1784_v13  ;;  %v2552_v37 = vld [vmem:[%s3382_s10 + $0x8] sm:$0xff] }
 0x3c1   : > { %v1982_v41 = vpop.f32.mrf.mxu1  ;;  %v2079_v38 = vpop.f32.mrf.mxu0 }
 0x3c2   : > { %v2090_v20 = vadd.f32 %v2079_v38, %v1987_v4  ;;  %v1989_v34 = vadd.f32 %v1982_v41, %v1886_v14  ;;  %v2537_v38 = vld [vmem:[%s3383_s11 + $0x10] sm:$0xff] }
 0x3c3   : > { %v1984_v46 = vpop.f32.mrf.mxu1  ;;  %v2081_v48 = vpop.f32.mrf.mxu0 }
 0x3c4   : > { %v2091_v43 = vadd.f32 %v2081_v48, %v1988_v19  ;;  %v1990_v12 = vadd.f32 %v1984_v46, %v1887_v25  ;;  %v2553_v46 = vld [vmem:[%s3382_s10 + $0x10] sm:$0xff]  ;;  %v2554_v48 = vld [vmem:[%s3382_s10 + $0x18] sm:$0xff] }
 0x3c5   : > { %v2085_v56 = vpop.f32.mrf.mxu0  ;;  %v2182_v58 = vpop.f32.mrf.mxu1 }
 0x3c6   : > { %v2193_v51 = vadd.f32 %v2182_v58, %v2090_v20  ;;  %v2092_v26 = vadd.f32 %v2085_v56, %v1989_v34 }
 0x3c7   : > { %v2087_v7 = vpop.f32.mrf.mxu0  ;;  %v2184_v8 = vpop.f32.mrf.mxu1 }
 0x3c8   : > { %v2194_v39 = vadd.f32 %v2184_v8, %v2091_v43  ;;  %v2093_v28 = vadd.f32 %v2087_v7, %v1990_v12 }
 0x3c9   : > { %v2188_v23 = vpop.f32.mrf.mxu1  ;;  %v2285_v24 = vpop.f32.mrf.mxu0 }
 0x3ca   : > { %v2296_v55 = vadd.f32 %v2285_v24, %v2193_v51  ;;  %v2195_v1 = vadd.f32 %v2188_v23, %v2092_v26  ;;  %v2429_v23 = vld [vmem:[%s3378_s6] sm:$0xff] }
 0x3cb   : > { %v2190_v47 = vpop.f32.mrf.mxu1  ;;  %v2287_v11 = vpop.f32.mrf.mxu0  ;;  %2742 = vmatprep.mubr.msk.f32.mxu0 %vm800_vm4, %v2429_v23 }
 0x3cc   : > { %v2297_v6 = vadd.f32 %v2287_v11, %v2194_v39  ;;  %v2196_v10 = vadd.f32 %v2190_v47, %v2093_v28  ;;  %v2430_v47 = vld [vmem:[%s3378_s6 + $0x8] sm:$0x3] }
 0x3cd   : > { %v2291_v5 = vpop.f32.mrf.mxu0  ;;  %v2388_v27 = vpop.f32.mrf.mxu1 }
 0x3ce   : > { %v2399_v45 = vadd.f32 %v2388_v27, %v2296_v55  ;;  %v2298_v53 = vadd.f32 %v2291_v5, %v2195_v1 }
 0x3cf   : > { %v2293_v49 = vpop.f32.mrf.mxu0  ;;  %v2390_v9 = vpop.f32.mrf.mxu1 }
 0x3d0   : > { %v2400_v57 = vadd.f32 %v2390_v9, %v2297_v6  ;;  %v2413_v15 = vadd.f32 %v2406_v59, %v2399_v45  ;;  %v2299_v61 = vadd.f32 %v2293_v49, %v2196_v10 }
 0x3d1   : > { %v2394_v16 = vpop.f32.mrf.mxu1 }
 0x3d2   : > { %v2414_v3 = vadd.f32 %v2406_v59, %v2400_v57  ;;  %v2417_v21 = vmax.f32 %v2413_v15, 0.0  ;;  %v2401_v22 = vadd.f32 %v2394_v16, %v2298_v53  ;;  %v2432_v57 = vld [vmem:[%s3379_s7 + $0x8] sm:$0x3]  ;;  %v2431_v16 = vld [vmem:[%s3379_s7] sm:$0xff] }
 0x3d3   : > { %v2396_v18 = vpop.f32.mrf.mxu1 }
 0x3d4   : > { %v2418_v32 = vmax.f32 %v2414_v3, 0.0  ;;  %v2415_v35 = vadd.f32 %v2411_v30, %v2401_v22  ;;  %v2402_v36 = vadd.f32 %v2396_v18, %v2299_v61  ;;  %vm2539_vm0 = vcmp.gt.f32.partialorder %v2417_v21, %v2535_v29 }
 0x3d5   : > { %vm2555_vm1 = vcmp.lt.f32.partialorder %v2417_v21, %v2551_v17  ;;  %v2722_v54 = vsel %vm2539_vm0, 1.0, %v2794_v62 }
 0x3d6   : > { %v2419_v33 = vmax.f32 %v2415_v35, 0.0  ;;  %v2416_v40 = vadd.f32 %v2411_v30, %v2402_v36  ;;  %v2421_v41 = vadd.f32 %v2418_v32, %v2417_v21  ;;  %vm2540_vm9 = vcmp.gt.f32.partialorder %v2418_v32, %v2536_v31 }
 0x3d7   : > { %v2723_v42 = vsel %vm2540_vm9, 1.0, %v2794_v62  ;;  %vm2556_vm10 = vcmp.lt.f32.partialorder %v2418_v32, %v2552_v37  ;;  %v2726_v56 = vsel %vm2555_vm1, 1.0, %v2794_v62 }
 0x3d8   : > { %v2420_v50 = vmax.f32 %v2416_v40, 0.0  ;;  %2422 = vadd.xlane.f32.xlu1 %v2421_v41  ;;  %v2727_v52 = vsel %vm2556_vm10, 1.0, %v2794_v62  ;;  %vm2541_vm11 = vcmp.gt.f32.partialorder %v2419_v33, %v2537_v38  ;;  %vm2557_vm13 = vcmp.lt.f32.partialorder %v2419_v33, %v2553_v46 }
 0x3d9   : > { %v2568_v58 = vadd.f32 %v2727_v52, %v2723_v42  ;;  %v2567_v4 = vadd.f32 %v2726_v56, %v2722_v54  ;;  %v2724_v7 = vsel %vm2541_vm11, 1.0, %v2794_v62  ;;  %v2728_v8 = vsel %vm2557_vm13, 1.0, %v2794_v62 }
 0x3da   : > { %v2424_v60 = vadd.f32 %v2420_v50, %v2419_v33  ;;  %vm2542_vm12 = vcmp.gt.f32.partialorder %v2420_v50, %v2538_v44  ;;  %vm2558_vm14 = vcmp.lt.f32.partialorder %v2420_v50, %v2554_v48  ;;  %v2569_v19 = vadd.f32 %v2728_v8, %v2724_v7 }
 0x3db   : > { %v2725_v63 = vsel %vm2542_vm12, 1.0, %v2794_v62  ;;  %v2729_v0 = vsel %vm2558_vm14, 1.0, %v2794_v62  ;;  %v2580_v13 = vadd.f32 %v2568_v58, %v2567_v4 }
 0x3dc   : > { %2425 = vadd.xlane.f32.xlu0 %v2424_v60  ;;  %2572 = vadd.xlane.f32.xlu1 %v3141_v2  ;;  %v2570_v14 = vadd.f32 %v2729_v0, %v2725_v63 }
 0x3de   : > { %v2583_v20 = vadd.f32 %v2570_v14, %v2569_v19 }
 0x3e0   : > { %2581 = vadd.xlane.f32.xlu0 %v2580_v13 }
 0x3e4   : > { %2584 = vadd.xlane.f32.xlu0 %v2583_v20 }
 0x461   : > { %v2423_v24 = vpop.xlane.xlu1 %2422 }
 0x462   : > { %v2427_v51 = vmul.f32 0.00390625, %v2423_v24 }
 0x465   : > { %v2426_v25 = vpop.xlane.xlu0 %2425  ;;  %v2573_v2 = vpop.xlane.xlu1 %2572 }
 0x466   : > { %v2428_v34 = vmul.f32 0.00390625, %v2426_v25  ;;  %v2574_v43 = vrot.slane %v2573_v2, 4 }
 0x468   : > { %2738 = vmatprep.subr.mxu0 %v2428_v34  ;;  %v2575_v11 = vadd.f32 %v2574_v43, %v2573_v2 }
 0x469   : > { %2739 = vmatpush3.msra.mxu0 %v2428_v34  ;;  %v2582_v62 = vpop.xlane.xlu0 %2581 }
 0x46a   : > { %2740 = vmatprep.subr.mxu0 %v2427_v51  ;;  %v2576_v26 = vrot.slane %v2575_v11, 2 }
 0x46b   : > { %2741 = vmatpush3.msra.mxu0 %v2427_v51 }
 0x46c   : > { %2743 = vmatmul.mubr.msk.f32.vlgmr.msra.gmra.mxu0 %vm800_vm4, %v2430_v47  ;;  %v2577_v59 = vadd.f32 %v2576_v26, %v2575_v11  ;;  %vm2596_vm4 = vcmask 0  }
 0x46d   : > { %v2585_v12 = vpop.xlane.xlu0 %2584 }
 0x46e   : > { %v2586_v39 = vadd.f32 %v2585_v12, %v2582_v62  ;;  %v2578_v28 = vrot.slane %v2577_v59, 1 }
 0x470   : > { %v2587_v55 = vrot.slane %v2586_v39, 4  ;;  %v2579_v45 = vadd.f32 %v2578_v28, %v2577_v59 }
 0x472   : > { %v2588_v5 = vadd.f32 %v2587_v55, %v2586_v39 }
 0x474   : > { %v2589_v27 = vrot.slane %v2588_v5, 2 }
 0x476   : > { %v2590_v1 = vadd.f32 %v2589_v27, %v2588_v5 }
 0x478   : > { %v2591_v6 = vrot.slane %v2590_v1, 1 }
 0x47a   : > { %v2592_v49 = vadd.f32 %v2591_v6, %v2590_v1 }
 0x47c   : > { %v2593_v9 = vadd.f32 %v2592_v49, %v2579_v45 }
 0x47e   : > { %v2594_v10 = vmul.f32 0.00016276042, %v2593_v9 }
 0x480   : > { %v2595_v53 = vsub.f32 1.0, %v2594_v10 }
 0x482   : > { %2597 = vst.msk [vmem:[%s449_s22] sm:$0x1] %vm2596_vm4, %v2595_v53 }
 0x52c   : > { %v2744_v15 = vpop.f32.mrf.mxu0 }
 0x52d   : > { %v2511_v61 = vadd.f32 %v2744_v15, %v2432_v57 }
 0x52e   : > { %v2505_v3 = vpop.f32.mrf.mxu0 }
 0x52f   : > { %2516 = vst.msk [vmem:[%s446_s24 + $0x8] sm:$0x3] %vm2515_vm15, %v2511_v61  ;;  %v2506_v21 = vadd.f32 %v2505_v3, %v2431_v16 }
 0x531   : > { %2514 = vst.msk [vmem:[%s446_s24] sm:$0xff] %vm503_vm2, %v2506_v21 }
 0x532 PF: > { %s24_s25 = sadd.s32 1, %s2779_s25  }
 0x533   : > { %p21_p4 = scmp.ge.s32.totalorder %s24_s25, 4  }
 0x535   :  { %23 = sbr.rel (!%p21_p4) target bundleno = 1 (0x1), region = 110 }

</bundles_post_ra>
